<compile_context>
chip_gen: v6e
topology: v6e:2x2x1
jax: 0.10.0
libtpu: 0.0.40
codegen_flags: <defaults>
</compile_context>

<pallas_src>
import functools
import numpy as np
import jax
import jax.numpy as jnp
from jax.experimental import pallas as pl
from jax.experimental.pallas import tpu as pltpu

# ----------------- hyper-parameters consistent with the module -----------------
WIN_SIZE = 64          # win_size  (sequence length L)
N_FEATURES = 4         # n_features / c_in
SEQ_SIZE = 5           # seq_size for TemEnc running statistics
D_MODEL = 8            # d_model (only shapes the all-zero mask tokens)
FR = 0.25              # frequency masking quantile
TR = 0.1               # temporal masking ratio
KSIZE = 4              # Conv1d kernel_size (stride = 1)
NUM_CHANNEL = [32, 32, 40]
SCALES = (16, 32, 48)  # scale1, scale2, scale3 (4th scale is the full length)
INIT_ALPHA = 1.0
ADAPT_POOL = 64        # nn.AdaptiveMaxPool1d(64), hard-coded in the module

CM = NUM_CHANNEL[1]    # conv1 output channels (32)
CO = NUM_CHANNEL[2]    # conv2 output channels == num_channel[-1] (40)

# Padded per-sample row layout used inside the kernel (even & 8-aligned).
T1P = 64               # conv1 rows per sample (real rows T-K+1 <= 61, zero-padded)
T2P = T1P // 2         # 32 rows per sample after MaxPool1d(2)
T4P = T2P // 2         # 16 rows per sample after the second MaxPool1d(2)
SHIFT_PAD = 8          # zero rows appended to the pooled-1 scratch for conv2 shifts


def _conv_lengths(T):
    K = KSIZE
    T1 = T - K + 1          # after conv1
    T2 = T1 // 2            # after maxpool1
    T3 = T2 - K + 1         # after conv2
    T4 = T3 // 2            # after maxpool2
    return T1, T2, T3, T4


# ================================================================================
# Pallas kernel: fused CNN pipeline of CNNFeatureExtractor for ALL scales and ALL
# stacked invocations.
#   Conv1d(C->32,k4) -> ReLU -> MaxPool(2) -> Conv1d(32->40,k4) -> ReLU ->
#   MaxPool(2) -> AdaptiveConcatPool1d ([avg, avg]) -> Linear(80,40) -> ReLU ->
#   (Dropout: identity) -> Linear(40,C)
# grid=(S,) over scales; the whole stacked batch (B_eff rows) per grid step.
# ================================================================================
@functools.lru_cache(maxsize=None)
def build_cnn_pipeline(B_eff, S):
    K, C = KSIZE, N_FEATURES
    N1 = B_eff * T1P      # conv1 slab rows
    N2 = B_eff * T2P      # pooled-1 / conv2 slab rows
    N3 = B_eff * T4P      # pooled-2 slab rows

    def kernel(xc_ref, w1_ref, w2_ref, fc1w_ref, fc2w_ref, bias_ref, pool_ref,
               out_ref, h_scr, hp_scr, g_scr):
        b1 = bias_ref[0:1, 0:CM]
        b2 = bias_ref[1:2, 0:CO]
        fb1 = bias_ref[2:3, 0:CO]
        fb2 = bias_ref[3:4, 0:C]

        # ---- Conv1 + ReLU: one MXU contraction for the whole stacked batch ----
        h = jnp.dot(xc_ref[...], w1_ref[...],
                    preferred_element_type=jnp.float32) + b1
        h_scr[...] = jnp.maximum(h, 0.0)                       # (N1, CM) f32

        # ---- MaxPool1d(2): per-sample segments are even & 8-aligned (T1P=64),
        #      so a single whole-slab stride-2 max never crosses samples. ----
        hp_scr[0:N2, :] = jnp.maximum(h_scr[pl.ds(0, N2, 2), :],
                                      h_scr[pl.ds(1, N2, 2), :])
        # zero the shift overhang so conv2's shifted reads stay finite
        hp_scr[N2:N2 + SHIFT_PAD, :] = jnp.zeros((SHIFT_PAD, CM), jnp.float32)

        # ---- Conv2 + ReLU as K shifted-slab matmuls (no im2col scatter) ----
        g = jnp.dot(hp_scr[0:N2, :].astype(jnp.bfloat16), w2_ref[0],
                    preferred_element_type=jnp.float32)
        for k in range(1, K):
            g = g + jnp.dot(hp_scr[k:k + N2, :].astype(jnp.bfloat16), w2_ref[k],
                            preferred_element_type=jnp.float32)
        g_scr[...] = jnp.maximum(g + b2, 0.0)                  # (N2, CO) f32

        # ---- MaxPool1d(2) + AdaptiveConcatPool1d ([avg, avg]) ----
        gm = jnp.maximum(g_scr[pl.ds(0, N3, 2), :], g_scr[pl.ds(1, N3, 2), :])
        # per-scale averaging matrix masks the padded rows and divides by the
        # real T4 for this scale (one tiny MXU op, replaces per-sample means)
        avg = jnp.dot(pool_ref[...], gm, preferred_element_type=jnp.float32)

        # ---- fc head: concat([avg, avg]) folded into fc1; Dropout = identity ----
        z = jnp.maximum(jnp.dot(avg.astype(jnp.bfloat16), fc1w_ref[...],
                                preferred_element_type=jnp.float32) + fb1, 0.0)
        out_ref[...] = (jnp.dot(z.astype(jnp.bfloat16), fc2w_ref[...],
                                preferred_element_type=jnp.float32) + fb2)

    call = pl.pallas_call(
        kernel,
        grid=(S,),
        in_specs=[
            pl.BlockSpec((None, N1, K * C), lambda i: (i, 0, 0)),   # im2col'd x (bf16)
            pl.BlockSpec((K * C, CM), lambda i: (0, 0)),            # conv1 W (bf16)
            pl.BlockSpec((K, CM, CO), lambda i: (0, 0, 0)),         # conv2 W per tap (bf16)
            pl.BlockSpec((CO, CO), lambda i: (0, 0)),               # fc1 W, halves summed (bf16)
            pl.BlockSpec((CO, C), lambda i: (0, 0)),                # fc2 W (bf16)
            pl.BlockSpec((4, 128), lambda i: (0, 0)),               # packed biases (f32)
            pl.BlockSpec((None, B_eff, N3), lambda i: (i, 0, 0)),   # per-scale avg matrix
        ],
        out_specs=pl.BlockSpec((None, B_eff, C), lambda i: (i, 0, 0)),
        out_shape=jax.ShapeDtypeStruct((S, B_eff, C), jnp.float32),
        scratch_shapes=[
            pltpu.VMEM((N1, CM), jnp.float32),                 # conv1 activations
            pltpu.VMEM((N2 + SHIFT_PAD, CM), jnp.float32),     # pooled-1 (+ zero overhang)
            pltpu.VMEM((N2, CO), jnp.float32),                 # conv2 activations
        ],
        compiler_params=pltpu.CompilerParams(
            dimension_semantics=("parallel",)),
    )

    def run(xc_packed, pool_mats, p):
        # xc_packed: (S, B_eff*T1P, K*C) bf16 ; pool_mats: (S, B_eff, B_eff*T4P) f32
        return call(xc_packed, p["conv1_w"], p["conv2_w"], p["fc1_w_sum"],
                    p["fc2_w"], p["bias_pack"], pool_mats)

    return run


# ================================================================================
# Glue (plain JAX): im2col packing, adaptive pooling, masking logic, FFT, tiny MLP
# ================================================================================
def _im2col_conv1_padded(x):
    # x: (N, T, C) -> (N, T1P, K*C); valid rows 0..T-K, zero-padded to T1P rows,
    # columns ordered k-major / channel-minor (matches conv1_w packing).
    N, T, C = x.shape
    T1 = T - KSIZE + 1
    cols = jnp.concatenate([x[:, k:k + T1, :] for k in range(KSIZE)], axis=-1)
    return jnp.pad(cols, ((0, 0), (0, T1P - T1), (0, 0)))


def adaptive_max_pool_time(x, out_size):
    # torch.nn.AdaptiveMaxPool1d(out_size) along time for x: (B, T, C)
    # TODO(synk): irregular windows precomputed statically; one gather + max (XLA-side).
    T = x.shape[1]
    if T == out_size:
        return x
    i = np.arange(out_size)
    starts = (i * T) // out_size
    ends = -(((-(i + 1)) * T) // out_size)          # ceil((i+1)*T/out)
    W = int(np.max(ends - starts))
    idx = np.minimum(starts[:, None] + np.arange(W)[None, :], ends[:, None] - 1)
    return jnp.max(x[:, jnp.asarray(idx), :], axis=2)        # (B, out_size, C)


@functools.lru_cache(maxsize=None)
def _pool_matrices(B_eff, t4s):
    # (S, B_eff, B_eff*T4P): entry [s, b, b*T4P + r] = 1/t4s[s] for r < t4s[s], else 0.
    S = len(t4s)
    P = np.zeros((S, B_eff, B_eff * T4P), np.float32)
    for s, t4 in enumerate(t4s):
        for b in range(B_eff):
            P[s, b, b * T4P:b * T4P + t4] = 1.0 / t4
    return jnp.asarray(P)


def pro_mlp(x, w1, b1, w2, b2):
    # tiny (C x C) projection head; exact erf GELU, as in torch nn.GELU()
    h = jax.nn.gelu(x @ w1.T + b1, approximate=False)
    return jax.nn.sigmoid(h @ w2.T + b2)


def cnn_feature_extractor_stacked(params, inputs):
    # Runs CNNFeatureExtractor.forward for several inputs (stacked along batch)
    # in ONE pallas_call; returns the alpha-combined per-input outputs (M, B, C).
    B = inputs[0].shape[0]
    M = len(inputs)
    B_eff = M * B
    C = N_FEATURES

    per_scale = [[] for _ in range(4)]
    for y in inputs:                                   # y: (B, L_m, C), L_m may differ
        per_scale[0].append(y[:, -SCALES[0]:, :])                              # raw 16
        per_scale[1].append(adaptive_max_pool_time(y[:, -SCALES[1]:, :], ADAPT_POOL))
        per_scale[2].append(adaptive_max_pool_time(y[:, -SCALES[2]:, :], ADAPT_POOL))
        per_scale[3].append(adaptive_max_pool_time(y, ADAPT_POOL))             # full length

    xs = [jnp.concatenate(p, axis=0) for p in per_scale]      # (B_eff, T_s, C)
    t4s = []
    for x_s in xs:
        T1, T2, _, T4 = _conv_lengths(x_s.shape[1])
        assert T1 <= T1P and T2 >= KSIZE and T4 >= 1, "scale too short for the conv stack"
        t4s.append(T4)

    xc = jnp.stack([_im2col_conv1_padded(x_s) for x_s in xs], axis=0)  # (4, B_eff, T1P, K*C)
    xc = xc.reshape(4, B_eff * T1P, KSIZE * C).astype(jnp.bfloat16)
    pool_mats = _pool_matrices(B_eff, tuple(t4s))

    out = build_cnn_pipeline(B_eff, 4)(xc, pool_mats, params)          # (4, B_eff, C)
    out = out.reshape(4, M, B, C)
    # alpha1..alpha4 weighted sum (reference adds 0 * (oci @ causal_graph.T),
    # a dead term that is dropped here).
    return jnp.einsum("s,smbc->mbc", params["alphas"], out)            # (M, B, C)


def tem_select_unmasked(x):
    # TemEnc token selection: trailing running mean/var -> score -> keep top (L - tr).
    B, L, C = x.shape
    S = SEQ_SIZE
    tr_count = int(TR * WIN_SIZE)
    xp = jnp.pad(x, ((0, 0), (S - 1, 0), (0, 0)))
    xp2 = xp ** 2
    ws = sum(xp[:, k:k + L, :] for k in range(S))
    ws2 = sum(xp2[:, k:k + L, :] for k in range(S))
    div = jnp.minimum(jnp.arange(1, L + 1), S).astype(x.dtype)[None, :, None]
    ltrm = ws / div
    ltrd = ws2 / div - ltrm ** 2
    score = ltrd.sum(-1) / ltrm.sum(-1)                         # (B, L)
    # TODO(synk): top-k + gather of unmasked tokens stays in plain JAX (data-dependent).
    _, unmasked_idx = jax.lax.top_k(-score, L - tr_count)
    return jnp.take_along_axis(x, unmasked_idx[:, :, None], axis=1)


def fre_mask(x):
    # FreEnc frequency masking; mask_token is an all-zero complex parameter.
    # TODO(synk): rfft/irfft and the quantile threshold stay as jnp glue (no Pallas FFT).
    cx = jnp.fft.rfft(jnp.transpose(x, (0, 2, 1)), axis=-1)     # (B, C, F) complex
    mag = jnp.sqrt(cx.real ** 2 + cx.imag ** 2)
    q = jnp.quantile(mag, FR, axis=2, keepdims=True)
    cx = jnp.where(mag < q, jnp.zeros_like(cx), cx)
    return jnp.transpose(jnp.fft.irfft(cx, axis=-1), (0, 2, 1))  # (B, L, C)


def contrative_cnn_forward(params, x):
    # TemEnc + FreEnc preprocessing, then all three extractor invocations share
    # a single stacked pallas_call.
    unmasked_tokens = tem_select_unmasked(x)               # (B, L - tr, C)
    ix = fre_mask(x)                                       # (B, L, C)
    oci = cnn_feature_extractor_stacked(params, [unmasked_tokens, x, ix])  # (3, B, C)

    ux = oci[0][:, None, :]                                # TemEnc enc(unmasked) -> x
    rec_tem = pro_mlp(ux, params["tem_pro_w1"], params["tem_pro_b1"],
                      params["tem_pro_w2"], params["tem_pro_b2"])
    tematt = [rec_tem]

    output = oci[1][None, :, :]                            # TemEnc enc(x) -> outputs
    causal_graph = params["causal_graph"]

    dx = oci[2][:, None, :]                                # FreEnc enc(ix) -> x
    rec_fre = pro_mlp(dx, params["fre_pro_w1"], params["fre_pro_b1"],
                      params["fre_pro_w2"], params["fre_pro_b2"])
    freatt = [rec_fre]
    return tematt, output, causal_graph, freatt


# ================================================================================
# Deterministic parameter init (shapes from the module's __init__)
# ================================================================================
def init_params(key):
    C, K = N_FEATURES, KSIZE
    ks = jax.random.split(key, 20)
    n = lambda k, s, sc=0.1: (sc * jax.random.normal(k, s)).astype(jnp.float32)

    conv1_w = n(ks[0], (CM, C, K))       # torch Conv1d weight (out, in, k)
    conv2_w = n(ks[1], (CO, CM, K))
    fc1_w = n(ks[2], (CO, 2 * CO))       # torch Linear(2*CO, CO) weight (out, in)
    fc2_w = n(ks[3], (C, CO))            # torch Linear(CO, C)

    conv1_b = n(ks[4], (CM,))
    conv2_b = n(ks[5], (CO,))
    fc1_b = n(ks[6], (CO,))
    fc2_b = n(ks[7], (C,))

    # pack the four bias vectors into a single (4, 128) f32 ref
    bias_pack = jnp.zeros((4, 128), jnp.float32)
    bias_pack = bias_pack.at[0, :CM].set(conv1_b)
    bias_pack = bias_pack.at[1, :CO].set(conv2_b)
    bias_pack = bias_pack.at[2, :CO].set(fc1_b)
    bias_pack = bias_pack.at[3, :C].set(fc2_b)

    return dict(
        # im2col-packed conv1: (out,in,k) -> (k*in, out); conv2 per-tap (k, in, out)
        conv1_w=jnp.transpose(conv1_w, (2, 1, 0)).reshape(K * C, CM).astype(jnp.bfloat16),
        conv2_w=jnp.transpose(conv2_w, (2, 1, 0)).astype(jnp.bfloat16),
        # AdaptiveConcatPool1d in the reference is [avg, avg] (both branches are
        # AdaptiveAvgPool1d) -> fold the two fc1 halves into one (CO, CO) matrix
        fc1_w_sum=jnp.transpose(fc1_w[:, :CO] + fc1_w[:, CO:]).astype(jnp.bfloat16),
        fc2_w=jnp.transpose(fc2_w).astype(jnp.bfloat16),
        bias_pack=bias_pack,
        alphas=jnp.full((4,), INIT_ALPHA, jnp.float32),
        causal_graph=n(ks[8], (C, C)),
        tem_pro_w1=n(ks[9], (C, C)), tem_pro_b1=n(ks[10], (C,)),
        tem_pro_w2=n(ks[11], (C, C)), tem_pro_b2=n(ks[12], (C,)),
        fre_pro_w1=n(ks[13], (C, C)), fre_pro_b1=n(ks[14], (C,)),
        fre_pro_w2=n(ks[15], (C, C)), fre_pro_b2=n(ks[16], (C,)),
    )


if __name__ == "__main__":
    key = jax.random.PRNGKey(0)
    pkey, xkey = jax.random.split(key)
    params = init_params(pkey)

    B = 2
    x = jax.random.normal(xkey, (B, WIN_SIZE, N_FEATURES), dtype=jnp.float32)

    forward = jax.jit(contrative_cnn_forward)
    tematt, output, causal_graph, freatt = forward(params, x)
    jax.block_until_ready((tematt, output, causal_graph, freatt))

    assert output.shape == (1, B, N_FEATURES)
    assert causal_graph.shape == (N_FEATURES, N_FEATURES)
    assert len(tematt) == 1 and tematt[0].shape == (B, 1, N_FEATURES)
    assert len(freatt) == 1 and freatt[0].shape == (B, 1, N_FEATURES)
    print("KERNEL_OK")
</pallas_src>

<mosaic_0001>
module attributes {stable_mosaic.version = 11 : i64} {
  func.func @kernel(%arg0: i32, %arg1: memref<1x384x16xbf16, #tpu.memory_space<vmem>>, %arg2: memref<16x32xbf16, #tpu.memory_space<vmem>>, %arg3: memref<4x32x40xbf16, #tpu.memory_space<vmem>>, %arg4: memref<40x40xbf16, #tpu.memory_space<vmem>>, %arg5: memref<40x4xbf16, #tpu.memory_space<vmem>>, %arg6: memref<4x128xf32, #tpu.memory_space<vmem>>, %arg7: memref<1x6x96xf32, #tpu.memory_space<vmem>>, %arg8: memref<1x6x4xf32, #tpu.memory_space<vmem>>, %arg9: memref<384x32xf32, #tpu.memory_space<vmem>>, %arg10: memref<200x32xf32, #tpu.memory_space<vmem>>, %arg11: memref<192x40xf32, #tpu.memory_space<vmem>>) attributes {dimension_semantics = [#tpu.dimension_semantics<parallel>], iteration_bounds = array<i64: 4>, scalar_prefetch = 0 : i64, scratch_operands = 3 : i64, tpu.core_type = #tpu.core_type<tc>, window_params = [{transform_indices = @transform_0, window_bounds = array<i64: 1, 384, 16>}, {pipeline_mode = #tpu.pipeline_mode<synchronous>, transform_indices = @transform_1, window_bounds = array<i64: 16, 32>}, {pipeline_mode = #tpu.pipeline_mode<synchronous>, transform_indices = @transform_2, window_bounds = array<i64: 4, 32, 40>}, {pipeline_mode = #tpu.pipeline_mode<synchronous>, transform_indices = @transform_3, window_bounds = array<i64: 40, 40>}, {pipeline_mode = #tpu.pipeline_mode<synchronous>, transform_indices = @transform_4, window_bounds = array<i64: 40, 4>}, {pipeline_mode = #tpu.pipeline_mode<synchronous>, transform_indices = @transform_5, window_bounds = array<i64: 4, 128>}, {transform_indices = @transform_6, window_bounds = array<i64: 1, 6, 96>}, {transform_indices = @transform_7, window_bounds = array<i64: 1, 6, 4>}]} {
    %c0 = arith.constant 0 : index
    %c0_0 = arith.constant 0 : index
    %0 = vector.load %arg6[%c0, %c0_0] : memref<4x128xf32, #tpu.memory_space<vmem>>, vector<1x32xf32>
    %c1 = arith.constant 1 : index
    %c0_1 = arith.constant 0 : index
    %1 = vector.load %arg6[%c1, %c0_1] : memref<4x128xf32, #tpu.memory_space<vmem>>, vector<1x40xf32>
    %c2 = arith.constant 2 : index
    %c0_2 = arith.constant 0 : index
    %2 = vector.load %arg6[%c2, %c0_2] : memref<4x128xf32, #tpu.memory_space<vmem>>, vector<1x40xf32>
    %c3 = arith.constant 3 : index
    %c0_3 = arith.constant 0 : index
    %3 = vector.load %arg6[%c3, %c0_3] : memref<4x128xf32, #tpu.memory_space<vmem>>, vector<1x4xf32>
    %c0_4 = arith.constant 0 : index
    %c0_5 = arith.constant 0 : index
    %c0_6 = arith.constant 0 : index
    %4 = vector.load %arg1[%c0_4, %c0_5, %c0_6] : memref<1x384x16xbf16, #tpu.memory_space<vmem>>, vector<1x384x16xbf16>
    %5 = vector.shape_cast %4 : vector<1x384x16xbf16> to vector<384x16xbf16>
    %c0_7 = arith.constant 0 : index
    %c0_8 = arith.constant 0 : index
    %6 = vector.load %arg2[%c0_7, %c0_8] : memref<16x32xbf16, #tpu.memory_space<vmem>>, vector<16x32xbf16>
    %cst = arith.constant dense<0.000000e+00> : vector<384x32xf32>
    %7 = tpu.matmul %5, %6, %cst {dimension_numbers = #tpu.dot_dimension_numbers<[1], [0], [0], [1], [0, 0, 1, 1], [], []>} : vector<384x16xbf16>, vector<16x32xbf16>, vector<384x32xf32> -> vector<384x32xf32>
    %8 = vector.broadcast %0 : vector<1x32xf32> to vector<384x32xf32>
    %9 = arith.addf %7, %8 : vector<384x32xf32>
    %cst_9 = arith.constant 0.000000e+00 : f32
    %10 = vector.broadcast %cst_9 : f32 to vector<384x32xf32>
    %11 = arith.maximumf %9, %10 : vector<384x32xf32>
    %c0_10 = arith.constant 0 : index
    %c0_11 = arith.constant 0 : index
    %12 = vector.load %arg9[%c0_10, %c0_11] : memref<384x32xf32, #tpu.memory_space<vmem>>, vector<384x32xf32>
    tpu.vector_store %arg9[%c0_10, %c0_11], %11 {strides = array<i32>} : memref<384x32xf32, #tpu.memory_space<vmem>>, vector<384x32xf32>,
    %c0_12 = arith.constant 0 : index
    %c0_13 = arith.constant 0 : index
    %13 = tpu.strided_load %arg9[%c0_12, %c0_13] {strides = array<i32: 2, 1>} : memref<384x32xf32, #tpu.memory_space<vmem>>, vector<192x32xf32>
    %c1_14 = arith.constant 1 : index
    %c0_15 = arith.constant 0 : index
    %14 = tpu.strided_load %arg9[%c1_14, %c0_15] {strides = array<i32: 2, 1>} : memref<384x32xf32, #tpu.memory_space<vmem>>, vector<192x32xf32>
    %15 = arith.maximumf %13, %14 : vector<192x32xf32>
    %c0_16 = arith.constant 0 : index
    %c0_17 = arith.constant 0 : index
    %16 = vector.load %arg10[%c0_16, %c0_17] : memref<200x32xf32, #tpu.memory_space<vmem>>, vector<192x32xf32>
    tpu.vector_store %arg10[%c0_16, %c0_17], %15 {strides = array<i32>} : memref<200x32xf32, #tpu.memory_space<vmem>>, vector<192x32xf32>,
    %cst_18 = arith.constant 0.000000e+00 : f32
    %17 = vector.broadcast %cst_18 : f32 to vector<8x32xf32>
    %c192 = arith.constant 192 : index
    %c0_19 = arith.constant 0 : index
    %18 = vector.load %arg10[%c192, %c0_19] : memref<200x32xf32, #tpu.memory_space<vmem>>, vector<8x32xf32>
    tpu.vector_store %arg10[%c192, %c0_19], %17 {strides = array<i32>} : memref<200x32xf32, #tpu.memory_space<vmem>>, vector<8x32xf32>,
    %c0_20 = arith.constant 0 : index
    %c0_21 = arith.constant 0 : index
    %19 = vector.load %arg10[%c0_20, %c0_21] : memref<200x32xf32, #tpu.memory_space<vmem>>, vector<192x32xf32>
    %20 = arith.truncf %19 : vector<192x32xf32> to vector<192x32xbf16>
    %c0_22 = arith.constant 0 : index
    %c0_23 = arith.constant 0 : index
    %c0_24 = arith.constant 0 : index
    %21 = vector.load %arg3[%c0_22, %c0_23, %c0_24] : memref<4x32x40xbf16, #tpu.memory_space<vmem>>, vector<1x32x40xbf16>
    %22 = vector.shape_cast %21 : vector<1x32x40xbf16> to vector<32x40xbf16>
    %cst_25 = arith.constant dense<0.000000e+00> : vector<192x40xf32>
    %23 = tpu.matmul %20, %22, %cst_25 {dimension_numbers = #tpu.dot_dimension_numbers<[1], [0], [0], [1], [0, 0, 1, 1], [], []>} : vector<192x32xbf16>, vector<32x40xbf16>, vector<192x40xf32> -> vector<192x40xf32>
    %c1_26 = arith.constant 1 : index
    %c0_27 = arith.constant 0 : index
    %24 = vector.load %arg10[%c1_26, %c0_27] : memref<200x32xf32, #tpu.memory_space<vmem>>, vector<192x32xf32>
    %25 = arith.truncf %24 : vector<192x32xf32> to vector<192x32xbf16>
    %c1_28 = arith.constant 1 : index
    %c0_29 = arith.constant 0 : index
    %c0_30 = arith.constant 0 : index
    %26 = vector.load %arg3[%c1_28, %c0_29, %c0_30] : memref<4x32x40xbf16, #tpu.memory_space<vmem>>, vector<1x32x40xbf16>
    %27 = vector.shape_cast %26 : vector<1x32x40xbf16> to vector<32x40xbf16>
    %cst_31 = arith.constant dense<0.000000e+00> : vector<192x40xf32>
    %28 = tpu.matmul %25, %27, %cst_31 {dimension_numbers = #tpu.dot_dimension_numbers<[1], [0], [0], [1], [0, 0, 1, 1], [], []>} : vector<192x32xbf16>, vector<32x40xbf16>, vector<192x40xf32> -> vector<192x40xf32>
    %29 = arith.addf %23, %28 : vector<192x40xf32>
    %c2_32 = arith.constant 2 : index
    %c0_33 = arith.constant 0 : index
    %30 = vector.load %arg10[%c2_32, %c0_33] : memref<200x32xf32, #tpu.memory_space<vmem>>, vector<192x32xf32>
    %31 = arith.truncf %30 : vector<192x32xf32> to vector<192x32xbf16>
    %c2_34 = arith.constant 2 : index
    %c0_35 = arith.constant 0 : index
    %c0_36 = arith.constant 0 : index
    %32 = vector.load %arg3[%c2_34, %c0_35, %c0_36] : memref<4x32x40xbf16, #tpu.memory_space<vmem>>, vector<1x32x40xbf16>
    %33 = vector.shape_cast %32 : vector<1x32x40xbf16> to vector<32x40xbf16>
    %cst_37 = arith.constant dense<0.000000e+00> : vector<192x40xf32>
    %34 = tpu.matmul %31, %33, %cst_37 {dimension_numbers = #tpu.dot_dimension_numbers<[1], [0], [0], [1], [0, 0, 1, 1], [], []>} : vector<192x32xbf16>, vector<32x40xbf16>, vector<192x40xf32> -> vector<192x40xf32>
    %35 = arith.addf %29, %34 : vector<192x40xf32>
    %c3_38 = arith.constant 3 : index
    %c0_39 = arith.constant 0 : index
    %36 = vector.load %arg10[%c3_38, %c0_39] : memref<200x32xf32, #tpu.memory_space<vmem>>, vector<192x32xf32>
    %37 = arith.truncf %36 : vector<192x32xf32> to vector<192x32xbf16>
    %c3_40 = arith.constant 3 : index
    %c0_41 = arith.constant 0 : index
    %c0_42 = arith.constant 0 : index
    %38 = vector.load %arg3[%c3_40, %c0_41, %c0_42] : memref<4x32x40xbf16, #tpu.memory_space<vmem>>, vector<1x32x40xbf16>
    %39 = vector.shape_cast %38 : vector<1x32x40xbf16> to vector<32x40xbf16>
    %cst_43 = arith.constant dense<0.000000e+00> : vector<192x40xf32>
    %40 = tpu.matmul %37, %39, %cst_43 {dimension_numbers = #tpu.dot_dimension_numbers<[1], [0], [0], [1], [0, 0, 1, 1], [], []>} : vector<192x32xbf16>, vector<32x40xbf16>, vector<192x40xf32> -> vector<192x40xf32>
    %41 = arith.addf %35, %40 : vector<192x40xf32>
    %42 = vector.broadcast %1 : vector<1x40xf32> to vector<192x40xf32>
    %43 = arith.addf %41, %42 : vector<192x40xf32>
    %cst_44 = arith.constant 0.000000e+00 : f32
    %44 = vector.broadcast %cst_44 : f32 to vector<192x40xf32>
    %45 = arith.maximumf %43, %44 : vector<192x40xf32>
    %c0_45 = arith.constant 0 : index
    %c0_46 = arith.constant 0 : index
    %46 = vector.load %arg11[%c0_45, %c0_46] : memref<192x40xf32, #tpu.memory_space<vmem>>, vector<192x40xf32>
    tpu.vector_store %arg11[%c0_45, %c0_46], %45 {strides = array<i32>} : memref<192x40xf32, #tpu.memory_space<vmem>>, vector<192x40xf32>,
    %c0_47 = arith.constant 0 : index
    %c0_48 = arith.constant 0 : index
    %47 = tpu.strided_load %arg11[%c0_47, %c0_48] {strides = array<i32: 2, 1>} : memref<192x40xf32, #tpu.memory_space<vmem>>, vector<96x40xf32>
    %c1_49 = arith.constant 1 : index
    %c0_50 = arith.constant 0 : index
    %48 = tpu.strided_load %arg11[%c1_49, %c0_50] {strides = array<i32: 2, 1>} : memref<192x40xf32, #tpu.memory_space<vmem>>, vector<96x40xf32>
    %49 = arith.maximumf %47, %48 : vector<96x40xf32>
    %c0_51 = arith.constant 0 : index
    %c0_52 = arith.constant 0 : index
    %c0_53 = arith.constant 0 : index
    %50 = vector.load %arg7[%c0_51, %c0_52, %c0_53] : memref<1x6x96xf32, #tpu.memory_space<vmem>>, vector<1x6x96xf32>
    %51 = vector.shape_cast %50 : vector<1x6x96xf32> to vector<6x96xf32>
    %cst_54 = arith.constant dense<0.000000e+00> : vector<6x40xf32>
    %52 = tpu.matmul %51, %49, %cst_54 {dimension_numbers = #tpu.dot_dimension_numbers<[1], [0], [0], [1], [0, 0, 1, 1], [], []>} : vector<6x96xf32>, vector<96x40xf32>, vector<6x40xf32> -> vector<6x40xf32>
    %53 = arith.truncf %52 : vector<6x40xf32> to vector<6x40xbf16>
    %c0_55 = arith.constant 0 : index
    %c0_56 = arith.constant 0 : index
    %54 = vector.load %arg4[%c0_55, %c0_56] : memref<40x40xbf16, #tpu.memory_space<vmem>>, vector<40x40xbf16>
    %cst_57 = arith.constant dense<0.000000e+00> : vector<6x40xf32>
    %55 = tpu.matmul %53, %54, %cst_57 {dimension_numbers = #tpu.dot_dimension_numbers<[1], [0], [0], [1], [0, 0, 1, 1], [], []>} : vector<6x40xbf16>, vector<40x40xbf16>, vector<6x40xf32> -> vector<6x40xf32>
    %56 = vector.broadcast %2 : vector<1x40xf32> to vector<6x40xf32>
    %57 = arith.addf %55, %56 : vector<6x40xf32>
    %cst_58 = arith.constant 0.000000e+00 : f32
    %58 = vector.broadcast %cst_58 : f32 to vector<6x40xf32>
    %59 = arith.maximumf %57, %58 : vector<6x40xf32>
    %60 = arith.truncf %59 : vector<6x40xf32> to vector<6x40xbf16>
    %c0_59 = arith.constant 0 : index
    %c0_60 = arith.constant 0 : index
    %61 = vector.load %arg5[%c0_59, %c0_60] : memref<40x4xbf16, #tpu.memory_space<vmem>>, vector<40x4xbf16>
    %cst_61 = arith.constant dense<0.000000e+00> : vector<6x4xf32>
    %62 = tpu.matmul %60, %61, %cst_61 {dimension_numbers = #tpu.dot_dimension_numbers<[1], [0], [0], [1], [0, 0, 1, 1], [], []>} : vector<6x40xbf16>, vector<40x4xbf16>, vector<6x4xf32> -> vector<6x4xf32>
    %63 = vector.broadcast %3 : vector<1x4xf32> to vector<6x4xf32>
    %64 = arith.addf %62, %63 : vector<6x4xf32>
    %c0_62 = arith.constant 0 : index
    %c0_63 = arith.constant 0 : index
    %c0_64 = arith.constant 0 : index
    %65 = vector.load %arg8[%c0_62, %c0_63, %c0_64] : memref<1x6x4xf32, #tpu.memory_space<vmem>>, vector<1x6x4xf32>
    %66 = vector.shape_cast %65 : vector<1x6x4xf32> to vector<6x4xf32>
    %67 = vector.shape_cast %64 : vector<6x4xf32> to vector<1x6x4xf32>
    tpu.vector_store %arg8[%c0_62, %c0_63, %c0_64], %67 {strides = array<i32>} : memref<1x6x4xf32, #tpu.memory_space<vmem>>, vector<1x6x4xf32>,
    return
  }
  func.func @transform_0(%arg0: i32) -> (i32, i32, i32) {
    %c0_i32 = arith.constant 0 : i32
    %c0_i32_0 = arith.constant 0 : i32
    %c0_i32_1 = arith.constant 0 : i32
    return %arg0, %c0_i32, %c0_i32_0 : i32, i32, i32
  }
  func.func @transform_1(%arg0: i32) -> (i32, i32) {
    %c0_i32 = arith.constant 0 : i32
    %c0_i32_0 = arith.constant 0 : i32
    %c0_i32_1 = arith.constant 0 : i32
    return %c0_i32, %c0_i32_0 : i32, i32
  }
  func.func @transform_2(%arg0: i32) -> (i32, i32, i32) {
    %c0_i32 = arith.constant 0 : i32
    %c0_i32_0 = arith.constant 0 : i32
    %c0_i32_1 = arith.constant 0 : i32
    %c0_i32_2 = arith.constant 0 : i32
    return %c0_i32, %c0_i32_0, %c0_i32_1 : i32, i32, i32
  }
  func.func @transform_3(%arg0: i32) -> (i32, i32) {
    %c0_i32 = arith.constant 0 : i32
    %c0_i32_0 = arith.constant 0 : i32
    %c0_i32_1 = arith.constant 0 : i32
    return %c0_i32, %c0_i32_0 : i32, i32
  }
  func.func @transform_4(%arg0: i32) -> (i32, i32) {
    %c0_i32 = arith.constant 0 : i32
    %c0_i32_0 = arith.constant 0 : i32
    %c0_i32_1 = arith.constant 0 : i32
    return %c0_i32, %c0_i32_0 : i32, i32
  }
  func.func @transform_5(%arg0: i32) -> (i32, i32) {
    %c0_i32 = arith.constant 0 : i32
    %c0_i32_0 = arith.constant 0 : i32
    %c0_i32_1 = arith.constant 0 : i32
    return %c0_i32, %c0_i32_0 : i32, i32
  }
  func.func @transform_6(%arg0: i32) -> (i32, i32, i32) {
    %c0_i32 = arith.constant 0 : i32
    %c0_i32_0 = arith.constant 0 : i32
    %c0_i32_1 = arith.constant 0 : i32
    return %arg0, %c0_i32, %c0_i32_0 : i32, i32, i32
  }
  func.func @transform_7(%arg0: i32) -> (i32, i32, i32) {
    %c0_i32 = arith.constant 0 : i32
    %c0_i32_0 = arith.constant 0 : i32
    %c0_i32_1 = arith.constant 0 : i32
    return %arg0, %c0_i32, %c0_i32_0 : i32, i32, i32
  }
}

</mosaic_0001>

<bundles_post_ra>
// kernel: reverse.0
= control target key start
LH: loop header
LB: loop body
LE: loop exit
PB: predicated region body
PF: predicated region fallthrough
CT: control target
= control target key end

     0   :  { %v2_v0 = vlaneseq  ;;  %s155_s0 = inlined_call_operand.vmem [shape: f32[2,4,31], index: 0, kind: input, shape index: {}]   ;;  %s156_s1 = inlined_call_operand.vmem [shape: f32[2,4,31], index: 1, kind: output, shape index: {}]  }
   0x2   :  { %v3_v1 = vsub.s32 30, %v2_v0 }
   0x4   :  { %4 = vset.pattern.permute.xlu0 %v3_v1 }
   0x5   :  { %v21_v2 = vld [vmem:[%s155_s0] sm:$0xff]  }
   0x6   :  { %22 = vst [vmem:[#allocation1] sm:$0xff] %v21_v2  }
   0xd   :  { %v57_v3 = vld [vmem:[#allocation1] sm:$0xf]  ;;  %v54_v4 = vld [vmem:[#allocation1 + $0x4] sm:$0xf] }
   0xe   :  { %58 = vst [vmem:[#allocation0] sm:$0xf] %v57_v3  ;;  %56 = vst [vmem:[#allocation0 + $0x8] sm:$0xf] %v54_v4 }
  0x15   :  { %v59_v5 = vld [vmem:[#allocation0] sm:$0xff]  ;;  %v65_v6 = vld [vmem:[#allocation0 + $0x8] sm:$0xff] }
  0x16   :  { %60 = vperm.xlu0 %4, %v59_v5  }
  0x1a   :  { %66 = vperm.xlu0 %4, %v65_v6  }
  0x91   :  { %v61_v7 = vpop.permute.xlu0 %60 }
  0x92   :  { %62 = vst [vmem:[#allocation2 + $0x8] sm:$0xff] %v61_v7 }
  0x95   :  { %v67_v8 = vpop.permute.xlu0 %66 }
  0x96   :  { %68 = vst [vmem:[#allocation2] sm:$0xff] %v67_v8 }
  0x99   :  { %v73_v9 = vld [vmem:[#allocation2 + $0x8] sm:$0xf] }
  0x9a   :  { %76 = vst [vmem:[#allocation3] sm:$0xf] %v73_v9 }
  0x9d   :  { %v78_v10 = vld [vmem:[#allocation2] sm:$0xf] }
  0x9e   :  { %82 = vst [vmem:[#allocation3 + $0x4] sm:$0xf] %v78_v10 }
  0xa1   :  { %v99_v11 = vld [vmem:[#allocation3] sm:$0xf] }
  0xa2   :  { %100 = vst [vmem:[%s156_s1] sm:$0xf] %v99_v11 }
  0xa5   :  { %v101_v12 = vld [vmem:[#allocation3 + $0x4] sm:$0xf] }
  0xa6   :  { %102 = vst [vmem:[%s156_s1 + $0x4] sm:$0xf] %v101_v12 }

// kernel: contrative_cnn_forward.1
= control target key start
LH: loop header
LB: loop body
LE: loop exit
PB: predicated region body
PF: predicated region fallthrough
CT: control target
= control target key end

     0   :  { %s2910_s24 = smov 0   ;;  %s3447_s0 = inlined_call_operand.vmem [shape: bf16[4,384,16], index: 0, kind: input, shape index: {}]   ;;  %s3448_s1 = inlined_call_operand.vmem [shape: bf16[16,32], index: 1, kind: input, shape index: {}]   ;;  %s3449_s2 = inlined_call_operand.vmem [shape: bf16[4,32,40], index: 2, kind: input, shape index: {}]   ;;  %s3450_s3 = inlined_call_operand.vmem [shape: bf16[40,40], index: 3, kind: input, shape index: {}]   ;;  %s3451_s4 = inlined_call_operand.vmem [shape: bf16[40,4], index: 4, kind: input, shape index: {}]   ;;  %s3452_s5 = inlined_call_operand.vmem [shape: f32[4,128], index: 5, kind: input, shape index: {}]   ;;  %s3453_s6 = inlined_call_operand.vmem [shape: f32[4,6,96], index: 6, kind: input, shape index: {}]   ;;  %s3454_s7 = inlined_call_operand.vmem [shape: f32[4,6,4], index: 7, kind: output, shape index: {}]  }
   0x1 LB: > { %s2359_s25 = sadd.s32 4294967295, %s2866_s24   ;;  %p2363_p0 = scmp.ge.s32.totalorder %s2866_s24, 1  ;;  %s2866_s24 = sphi %s2910_s24, %s17_s24  }
   0x2   : > { %p246_p1 = scmp.lt.s32.totalorder %s2866_s24, 5 }
   0x4   : > { %p247_p2 = pnand %p2363_p0, %p246_p1 }
   0x6   : > { %250 = sbr.rel (%p247_p2) target bundleno = 1256 (0x4e8), region = 48 }
   0xb   : > { %v2821_v0 = vld [vmem:[%s3448_s1] sm:$0xff]   ;;  %p281_p3 = scmp.lt.s32.totalorder %s2359_s25, 3  ;;  %vm479_vm0 = vcmask 130048   ;;  %v2846_v25 = vld [vmem:[%s3449_s2 + $0x18] sm:$0xff]   ;;  %v2847_v26 = vld [vmem:[%s3449_s2 + $0x28] sm:$0xff]   ;;  %vm825_vm1 = vcmask 261120  }
   0xc   : > { %2601 = vmatprep.subr.bf16.mxu0 %v2821_v0  ;;  %2651 = vmatprep.subr.bf16.mxu1 %v2846_v25  ;;  %v2848_v27 = vld [vmem:[%s3449_s2 + $0x10] sm:$0xff]   ;;  %v2849_v28 = vld [vmem:[%s3449_s2 + $0x20] sm:$0xff]   ;;  %v3455_v29 = vmov 0.0   ;;  %v2995_v30 = vld [vmem:[%s3449_s2 + $0x8] sm:$0xff]   ;;  %vm2869_vm2 = vmmov 0   ;;  %vm2176_vm3 = vcmask 1043456  }
   0xd   : > { %s3475_s25 = smov (!%p281_p3, %s2359_s25), 3  ;;  %2602 = vmatpush3.bf16.msra.mxu0 %v2821_v0  ;;  %2652 = vmatpush3.bf16.msra.mxu1 %v2846_v25  ;;  %1017 = vst.msk [vmem:[#allocation3 + $0xc0] sm:$0xff] %vm825_vm1, %v3455_v29  ;;  %v3001_v31 = vld [vmem:[%s3452_s5] ss:$0 sm:$0xff]  ;;  %vm1989_vm4 = vcmask 326656   ;;  %vm2074_vm5 = vcmask 785408  }
   0xe   : > { %s2810_s28 = smul.u32 192, %s3475_s25  ;;  %2707 = vmatprep.subr.bf16.mxu0 %v2847_v26  ;;  %2653 = vmatprep.subr.bf16.mxu1 %v2848_v27  ;;  %s2365_s14 = sshll.u32 %s3475_s25, 3  ;;  %vm2292_vm6 = vcmask 29696  }
   0xf   : > { %s289_s17 = scalar_lea.vmem %s3453_s6, %s2365_s14  ;;  %s293_s9 = scalar_lea.vmem %s3454_s7, %s2365_s14 }
  0x10   : > { %s2927_s8 = scalar_lea.vmem %s3447_s0, %s2810_s28 }
  0x11   : > { %v2822_v1 = vld [vmem:[%s2927_s8] sm:$0xff]   ;;  %v2823_v2 = vld [vmem:[%s2927_s8 + $0x8] sm:$0xff]   ;;  %v2824_v3 = vld [vmem:[%s2927_s8 + $0x10] sm:$0xff]   ;;  %2654 = vmatpush3.bf16.msra.mxu1 %v2848_v27 }
  0x12   : > { %2603 = vmatprep.mubr.msk.bf16.mxu0 %vm479_vm0, %v2822_v1  ;;  %v2825_v4 = vld [vmem:[%s2927_s8 + $0x18] sm:$0xff]   ;;  %v2826_v5 = vld [vmem:[%s2927_s8 + $0x20] sm:$0xff]   ;;  %v2827_v6 = vld [vmem:[%s2927_s8 + $0x28] sm:$0xff]   ;;  %2679 = vmatprep.subr.bf16.mxu1 %v2995_v30 }
  0x13   : > { %2604 = vmatmul.mubr.msk.bf16.vlgmr.msra.gmra.mxu0 %vm479_vm0, %v2823_v2  ;;  %v2828_v7 = vld [vmem:[%s2927_s8 + $0x30] sm:$0xff]   ;;  %v2829_v8 = vld [vmem:[%s2927_s8 + $0x38] sm:$0xff]   ;;  %v2830_v9 = vld [vmem:[%s2927_s8 + $0x40] sm:$0xff]  }
  0x14   : > { %2607 = vmatprep.mubr.msk.bf16.mxu0 %vm479_vm0, %v2824_v3  ;;  %v2831_v10 = vld [vmem:[%s2927_s8 + $0x48] sm:$0xff]   ;;  %v2832_v11 = vld [vmem:[%s2927_s8 + $0x50] sm:$0xff]   ;;  %v2833_v12 = vld [vmem:[%s2927_s8 + $0x58] sm:$0xff]   ;;  %2708 = vmatpush3.bf16.msra.mxu0 %v2847_v26 }
  0x15   : > { %v2834_v13 = vld [vmem:[%s2927_s8 + $0x60] sm:$0xff]   ;;  %v2835_v14 = vld [vmem:[%s2927_s8 + $0x68] sm:$0xff]   ;;  %v2836_v15 = vld [vmem:[%s2927_s8 + $0x70] sm:$0xff]   ;;  %2709 = vmatprep.subr.bf16.mxu0 %v2849_v28 }
  0x16   : > { %v2837_v16 = vld [vmem:[%s2927_s8 + $0x78] sm:$0xff]   ;;  %v2838_v17 = vld [vmem:[%s2927_s8 + $0x80] sm:$0xff]   ;;  %v2839_v18 = vld [vmem:[%s2927_s8 + $0x88] sm:$0xff]  }
  0x17   : > { %v2840_v19 = vld [vmem:[%s2927_s8 + $0x90] sm:$0xff]   ;;  %v2841_v20 = vld [vmem:[%s2927_s8 + $0x98] sm:$0xff]   ;;  %v2842_v21 = vld [vmem:[%s2927_s8 + $0xa0] sm:$0xff]  }
  0x18   : > { %v2843_v22 = vld [vmem:[%s2927_s8 + $0xa8] sm:$0xff]   ;;  %v2844_v23 = vld [vmem:[%s2927_s8 + $0xb0] sm:$0xff]   ;;  %v2845_v24 = vld [vmem:[%s2927_s8 + $0xb8] sm:$0xff]   ;;  %2710 = vmatpush3.bf16.msra.mxu0 %v2849_v28 }
  0x19   : > { %2763 = vmatprep.subr.mxu0 %v3455_v29 }
  0x1b   : > { %2608 = vmatmul.mubr.msk.bf16.gmra.mxu0 %vm479_vm0, %v2825_v4 }
  0x1c   : > { %2611 = vmatprep.mubr.msk.bf16.mxu0 %vm479_vm0, %v2826_v5 }
  0x23   : > { %2612 = vmatmul.mubr.msk.bf16.gmra.mxu0 %vm479_vm0, %v2827_v6 }
  0x24   : > { %2615 = vmatprep.mubr.msk.bf16.mxu0 %vm479_vm0, %v2828_v7 }
  0x2b   : > { %2616 = vmatmul.mubr.msk.bf16.gmra.mxu0 %vm479_vm0, %v2829_v8 }
  0x2c   : > { %2619 = vmatprep.mubr.msk.bf16.mxu0 %vm479_vm0, %v2830_v9 }
  0x33   : > { %2620 = vmatmul.mubr.msk.bf16.gmra.mxu0 %vm479_vm0, %v2831_v10 }
  0x34   : > { %2623 = vmatprep.mubr.msk.bf16.mxu0 %vm479_vm0, %v2832_v11 }
  0x3b   : > { %2624 = vmatmul.mubr.msk.bf16.gmra.mxu0 %vm479_vm0, %v2833_v12 }
  0x3c   : > { %2627 = vmatprep.mubr.msk.bf16.mxu0 %vm479_vm0, %v2834_v13 }
  0x43   : > { %2628 = vmatmul.mubr.msk.bf16.gmra.mxu0 %vm479_vm0, %v2835_v14 }
  0x44   : > { %2631 = vmatprep.mubr.msk.bf16.mxu0 %vm479_vm0, %v2836_v15 }
  0x4b   : > { %2632 = vmatmul.mubr.msk.bf16.gmra.mxu0 %vm479_vm0, %v2837_v16 }
  0x4c   : > { %2635 = vmatprep.mubr.msk.bf16.mxu0 %vm479_vm0, %v2838_v17 }
  0x53   : > { %2636 = vmatmul.mubr.msk.bf16.gmra.mxu0 %vm479_vm0, %v2839_v18 }
  0x54   : > { %2639 = vmatprep.mubr.msk.bf16.mxu0 %vm479_vm0, %v2840_v19 }
  0x5b   : > { %2640 = vmatmul.mubr.msk.bf16.gmra.mxu0 %vm479_vm0, %v2841_v20 }
  0x5c   : > { %2643 = vmatprep.mubr.msk.bf16.mxu0 %vm479_vm0, %v2842_v21 }
  0x63   : > { %2644 = vmatmul.mubr.msk.bf16.gmra.mxu0 %vm479_vm0, %v2843_v22 }
  0x64   : > { %2647 = vmatprep.mubr.msk.bf16.mxu0 %vm479_vm0, %v2844_v23 }
  0x6b   : > { %2648 = vmatmul.mubr.msk.bf16.gmra.mxu0 %vm479_vm0, %v2845_v24 }
  0xd3   : > { %v2605_v32 = vpop.f32.mrf.mxu0 }
  0xd4   : > { %v595_v33 = vadd.f32 %v2605_v32, %v3001_v31 }
  0xd5   : > { %v586_v34 = vpop.f32.mrf.mxu0 }
  0xd6   : > { %v779_v35 = vmax.f32 %v595_v33, 0.0  ;;  %v587_v36 = vadd.f32 %v3001_v31, %v586_v34 }
  0xd7   : > { %v2606_v37 = vpop.f32.mrf.mxu0 }
  0xd8   : > { %828 = vst.msk [vmem:[#allocation2 + $0x10] sm:$0xff] %vm825_vm1, %v779_v35  ;;  %v777_v38 = vmax.f32 %v587_v36, 0.0  ;;  %v598_v39 = vadd.f32 %v2606_v37, %v3001_v31 }
  0xd9   : > { %v589_v40 = vpop.f32.mrf.mxu0 }
  0xda   : > { %826 = vst.msk [vmem:[#allocation2] sm:$0xff] %vm825_vm1, %v777_v38  ;;  %v780_v41 = vmax.f32 %v598_v39, 0.0  ;;  %v590_v42 = vadd.f32 %v3001_v31, %v589_v40 }
  0xdb   : > { %v2609_v43 = vpop.f32.mrf.mxu0 }
  0xdc   : > { %829 = vst.msk [vmem:[#allocation2 + $0x18] sm:$0xff] %vm825_vm1, %v780_v41  ;;  %v778_v44 = vmax.f32 %v590_v42, 0.0  ;;  %v611_v45 = vadd.f32 %v2609_v43, %v3001_v31 }
  0xdd   : > { %v602_v46 = vpop.f32.mrf.mxu0 }
  0xde   : > { %827 = vst.msk [vmem:[#allocation2 + $0x8] sm:$0xff] %vm825_vm1, %v778_v44  ;;  %v783_v47 = vmax.f32 %v611_v45, 0.0  ;;  %v603_v48 = vadd.f32 %v3001_v31, %v602_v46 }
  0xdf   : > { %v2610_v49 = vpop.f32.mrf.mxu0 }
  0xe0   : > { %832 = vst.msk [vmem:[#allocation2 + $0x30] sm:$0xff] %vm825_vm1, %v783_v47  ;;  %v781_v50 = vmax.f32 %v603_v48, 0.0  ;;  %v614_v51 = vadd.f32 %v2610_v49, %v3001_v31 }
  0xe1   : > { %v605_v52 = vpop.f32.mrf.mxu0 }
  0xe2   : > { %830 = vst.msk [vmem:[#allocation2 + $0x20] sm:$0xff] %vm825_vm1, %v781_v50  ;;  %v784_v53 = vmax.f32 %v614_v51, 0.0  ;;  %v606_v54 = vadd.f32 %v3001_v31, %v605_v52 }
  0xe3   : > { %v876_v55 = vld [vmem:[#allocation2 + $0x10] ss:$2 sm:$0xff]  ;;  %v924_v56 = vld [vmem:[#allocation2 + $0x11] ss:$2 sm:$0xff]  ;;  %v2613_v57 = vpop.f32.mrf.mxu0 }
  0xe4   : > { %v970_v58 = vmax.f32 %v876_v55, %v924_v56  ;;  %833 = vst.msk [vmem:[#allocation2 + $0x38] sm:$0xff] %vm825_vm1, %v784_v53  ;;  %v782_v59 = vmax.f32 %v606_v54, 0.0  ;;  %v627_v60 = vadd.f32 %v2613_v57, %v3001_v31 }
  0xe5   : > { %v874_v61 = vld [vmem:[#allocation2] ss:$2 sm:$0xff]  ;;  %v922_v62 = vld [vmem:[#allocation2 + $0x1] ss:$2 sm:$0xff]  ;;  %v618_v63 = vpop.f32.mrf.mxu0 }
  0xe6   : > { %994 = vst.msk [vmem:[#allocation3 + $0x8] sm:$0xff] %vm825_vm1, %v970_v58  ;;  %v969_v0 = vmax.f32 %v874_v61, %v922_v62  ;;  %831 = vst.msk [vmem:[#allocation2 + $0x28] sm:$0xff] %vm825_vm1, %v782_v59  ;;  %v787_v1 = vmax.f32 %v627_v60, 0.0  ;;  %v619_v2 = vadd.f32 %v3001_v31, %v618_v63 }
  0xe7   : > { %v2614_v3 = vpop.f32.mrf.mxu0 }
  0xe8   : > { %993 = vst.msk [vmem:[#allocation3] sm:$0xff] %vm825_vm1, %v969_v0  ;;  %836 = vst.msk [vmem:[#allocation2 + $0x50] sm:$0xff] %vm825_vm1, %v787_v1  ;;  %v785_v4 = vmax.f32 %v619_v2, 0.0  ;;  %v630_v5 = vadd.f32 %v2614_v3, %v3001_v31 }
  0xe9   : > { %v621_v6 = vpop.f32.mrf.mxu0 }
  0xea   : > { %834 = vst.msk [vmem:[#allocation2 + $0x40] sm:$0xff] %vm825_vm1, %v785_v4  ;;  %v788_v7 = vmax.f32 %v630_v5, 0.0  ;;  %v622_v8 = vadd.f32 %v3001_v31, %v621_v6 }
  0xeb   : > { %v880_v9 = vld [vmem:[#allocation2 + $0x30] ss:$2 sm:$0xff]  ;;  %v928_v10 = vld [vmem:[#allocation2 + $0x31] ss:$2 sm:$0xff]  ;;  %v2617_v11 = vpop.f32.mrf.mxu0 }
  0xec   : > { %v972_v12 = vmax.f32 %v880_v9, %v928_v10  ;;  %837 = vst.msk [vmem:[#allocation2 + $0x58] sm:$0xff] %vm825_vm1, %v788_v7  ;;  %v786_v13 = vmax.f32 %v622_v8, 0.0  ;;  %v643_v14 = vadd.f32 %v2617_v11, %v3001_v31  ;;  %v2851_v11 = vld [vmem:[%s3449_s2] sm:$0xff]  }
  0xed   : > { %v878_v15 = vld [vmem:[#allocation2 + $0x20] ss:$2 sm:$0xff]  ;;  %v926_v16 = vld [vmem:[#allocation2 + $0x21] ss:$2 sm:$0xff]  ;;  %v634_v17 = vpop.f32.mrf.mxu0 }
  0xee   : > { %996 = vst.msk [vmem:[#allocation3 + $0x18] sm:$0xff] %vm825_vm1, %v972_v12  ;;  %v971_v18 = vmax.f32 %v878_v15, %v926_v16  ;;  %835 = vst.msk [vmem:[#allocation2 + $0x48] sm:$0xff] %vm825_vm1, %v786_v13  ;;  %v791_v19 = vmax.f32 %v643_v14, 0.0  ;;  %v635_v20 = vadd.f32 %v3001_v31, %v634_v17 }
  0xef   : > { %v2618_v21 = vpop.f32.mrf.mxu0  ;;  %v1058_v42 = vld [vmem:[#allocation3 + $0x1] sm:$0xff] }
  0xf0   : > { %995 = vst.msk [vmem:[#allocation3 + $0x10] sm:$0xff] %vm825_vm1, %v971_v18  ;;  %840 = vst.msk [vmem:[#allocation2 + $0x70] sm:$0xff] %vm825_vm1, %v791_v19  ;;  %v789_v22 = vmax.f32 %v635_v20, 0.0  ;;  %v646_v23 = vadd.f32 %v2618_v21, %v3001_v31  ;;  %v1453_v45 = vld [vmem:[#allocation3 + $0x2] sm:$0xff]  ;;  %v3070_v21 = vld [vmem:[%s3449_s2 + $0x38] sm:$0xff]  }
  0xf1   : > { %v637_v24 = vpop.f32.mrf.mxu0 }
  0xf2   : > { %838 = vst.msk [vmem:[#allocation2 + $0x60] sm:$0xff] %vm825_vm1, %v789_v22  ;;  %v792_v25 = vmax.f32 %v646_v23, 0.0  ;;  %v638_v26 = vadd.f32 %v3001_v31, %v637_v24 }
  0xf3   : > { %v884_v27 = vld [vmem:[#allocation2 + $0x50] ss:$2 sm:$0xff]  ;;  %v932_v28 = vld [vmem:[#allocation2 + $0x51] ss:$2 sm:$0xff]  ;;  %v2621_v32 = vpop.f32.mrf.mxu0 }
  0xf4   : > { %v974_v33 = vmax.f32 %v884_v27, %v932_v28  ;;  %841 = vst.msk [vmem:[#allocation2 + $0x78] sm:$0xff] %vm825_vm1, %v792_v25  ;;  %v790_v34 = vmax.f32 %v638_v26, 0.0  ;;  %v659_v35 = vadd.f32 %v2621_v32, %v3001_v31 }
  0xf5   : > { %v882_v36 = vld [vmem:[#allocation2 + $0x40] ss:$2 sm:$0xff]  ;;  %v930_v37 = vld [vmem:[#allocation2 + $0x41] ss:$2 sm:$0xff]  ;;  %v650_v38 = vpop.f32.mrf.mxu0 }
  0xf6   : > { %998 = vst.msk [vmem:[#allocation3 + $0x28] sm:$0xff] %vm825_vm1, %v974_v33  ;;  %v973_v39 = vmax.f32 %v882_v36, %v930_v37  ;;  %839 = vst.msk [vmem:[#allocation2 + $0x68] sm:$0xff] %vm825_vm1, %v790_v34  ;;  %v795_v40 = vmax.f32 %v659_v35, 0.0  ;;  %v651_v41 = vadd.f32 %v3001_v31, %v650_v38 }
  0xf7   : > { %v2622_v43 = vpop.f32.mrf.mxu0  ;;  %v1059_v44 = vld [vmem:[#allocation3 + $0x9] sm:$0xff]  ;;  %v1060_v2 = vld [vmem:[#allocation3 + $0x11] sm:$0xff] }
  0xf8   : > { %v1454_v46 = vld [vmem:[#allocation3 + $0xa] sm:$0xff]  ;;  %997 = vst.msk [vmem:[#allocation3 + $0x20] sm:$0xff] %vm825_vm1, %v973_v39  ;;  %844 = vst.msk [vmem:[#allocation2 + $0x90] sm:$0xff] %vm825_vm1, %v795_v40  ;;  %v793_v47 = vmax.f32 %v651_v41, 0.0  ;;  %v662_v48 = vadd.f32 %v2622_v43, %v3001_v31  ;;  %v1082_v49 = vpack.c.bf16 %v1059_v44, %v1058_v42  ;;  %v1455_v5 = vld [vmem:[#allocation3 + $0x12] sm:$0xff] }
  0xf9   : > { %v1477_v50 = vpack.c.bf16 %v1454_v46, %v1453_v45  ;;  %v653_v51 = vpop.f32.mrf.mxu0 }
  0xfa   : > { %842 = vst.msk [vmem:[#allocation2 + $0x80] sm:$0xff] %vm825_vm1, %v793_v47  ;;  %v796_v52 = vmax.f32 %v662_v48, 0.0  ;;  %v654_v53 = vadd.f32 %v3001_v31, %v653_v51  ;;  %2655 = vmatprep.mubr.msk.bf16.mxu1 %vm825_vm1, %v1082_v49 }
  0xfb   : > { %2711 = vmatprep.mubr.msk.bf16.mxu0 %vm825_vm1, %v1477_v50  ;;  %v888_v54 = vld [vmem:[#allocation2 + $0x70] ss:$2 sm:$0xff]  ;;  %v936_v55 = vld [vmem:[#allocation2 + $0x71] ss:$2 sm:$0xff]  ;;  %v2625_v56 = vpop.f32.mrf.mxu0 }
  0xfc   : > { %v976_v57 = vmax.f32 %v888_v54, %v936_v55  ;;  %845 = vst.msk [vmem:[#allocation2 + $0x98] sm:$0xff] %vm825_vm1, %v796_v52  ;;  %v794_v58 = vmax.f32 %v654_v53, 0.0  ;;  %v675_v59 = vadd.f32 %v2625_v56, %v3001_v31 }
  0xfd   : > { %v886_v60 = vld [vmem:[#allocation2 + $0x60] ss:$2 sm:$0xff]  ;;  %v934_v61 = vld [vmem:[#allocation2 + $0x61] ss:$2 sm:$0xff]  ;;  %v666_v62 = vpop.f32.mrf.mxu0 }
  0xfe   : > { %1000 = vst.msk [vmem:[#allocation3 + $0x38] sm:$0xff] %vm825_vm1, %v976_v57  ;;  %v975_v63 = vmax.f32 %v886_v60, %v934_v61  ;;  %843 = vst.msk [vmem:[#allocation2 + $0x88] sm:$0xff] %vm825_vm1, %v794_v58  ;;  %v799_v0 = vmax.f32 %v675_v59, 0.0  ;;  %v667_v1 = vadd.f32 %v3001_v31, %v666_v62 }
  0xff   : > { %v2626_v3 = vpop.f32.mrf.mxu0  ;;  %v1061_v4 = vld [vmem:[#allocation3 + $0x19] sm:$0xff]  ;;  %v1062_v27 = vld [vmem:[#allocation3 + $0x21] sm:$0xff] }
 0x100   : > { %v1456_v6 = vld [vmem:[#allocation3 + $0x1a] sm:$0xff]  ;;  %999 = vst.msk [vmem:[#allocation3 + $0x30] sm:$0xff] %vm825_vm1, %v975_v63  ;;  %848 = vst.msk [vmem:[#allocation2 + $0xb0] sm:$0xff] %vm825_vm1, %v799_v0  ;;  %v797_v7 = vmax.f32 %v667_v1, 0.0  ;;  %v678_v8 = vadd.f32 %v2626_v3, %v3001_v31  ;;  %v1083_v9 = vpack.c.bf16 %v1061_v4, %v1060_v2  ;;  %v1457_v33 = vld [vmem:[#allocation3 + $0x22] sm:$0xff] }
 0x101   : > { %v1478_v10 = vpack.c.bf16 %v1456_v6, %v1455_v5  ;;  %v669_v12 = vpop.f32.mrf.mxu0 }
 0x102   : > { %846 = vst.msk [vmem:[#allocation2 + $0xa0] sm:$0xff] %vm825_vm1, %v797_v7  ;;  %v800_v13 = vmax.f32 %v678_v8, 0.0  ;;  %v670_v14 = vadd.f32 %v3001_v31, %v669_v12  ;;  %2656 = vmatmul.mubr.msk.bf16.vlgmr.msra.gmra.mxu1 %vm825_vm1, %v1083_v9 }
 0x103   : > { %2712 = vmatmul.mubr.msk.bf16.vlgmr.msra.gmra.mxu0 %vm825_vm1, %v1478_v10  ;;  %v892_v15 = vld [vmem:[#allocation2 + $0x90] ss:$2 sm:$0xff]  ;;  %v940_v16 = vld [vmem:[#allocation2 + $0x91] ss:$2 sm:$0xff]  ;;  %v2629_v17 = vpop.f32.mrf.mxu0  ;;  %2680 = vmatpush3.bf16.msra.mxu1 %v2995_v30 }
 0x104   : > { %v978_v18 = vmax.f32 %v892_v15, %v940_v16  ;;  %849 = vst.msk [vmem:[#allocation2 + $0xb8] sm:$0xff] %vm825_vm1, %v800_v13  ;;  %v798_v19 = vmax.f32 %v670_v14, 0.0  ;;  %v691_v20 = vadd.f32 %v2629_v17, %v3001_v31  ;;  %2681 = vmatprep.subr.bf16.mxu1 %v2851_v11 }
 0x105   : > { %v890_v22 = vld [vmem:[#allocation2 + $0x80] ss:$2 sm:$0xff]  ;;  %v938_v23 = vld [vmem:[#allocation2 + $0x81] ss:$2 sm:$0xff]  ;;  %v682_v24 = vpop.f32.mrf.mxu0 }
 0x106   : > { %1002 = vst.msk [vmem:[#allocation3 + $0x48] sm:$0xff] %vm825_vm1, %v978_v18  ;;  %v977_v25 = vmax.f32 %v890_v22, %v938_v23  ;;  %847 = vst.msk [vmem:[#allocation2 + $0xa8] sm:$0xff] %vm825_vm1, %v798_v19  ;;  %v803_v30 = vmax.f32 %v691_v20, 0.0  ;;  %v683_v26 = vadd.f32 %v3001_v31, %v682_v24 }
 0x107   : > { %v2630_v28 = vpop.f32.mrf.mxu0  ;;  %v1063_v32 = vld [vmem:[#allocation3 + $0x29] sm:$0xff]  ;;  %2682 = vmatpush3.bf16.msra.mxu1 %v2851_v11  ;;  %v1064_v54 = vld [vmem:[#allocation3 + $0x31] sm:$0xff] }
 0x108   : > { %v1458_v34 = vld [vmem:[#allocation3 + $0x2a] sm:$0xff]  ;;  %1001 = vst.msk [vmem:[#allocation3 + $0x40] sm:$0xff] %vm825_vm1, %v977_v25  ;;  %852 = vst.msk [vmem:[#allocation2 + $0xd0] sm:$0xff] %vm825_vm1, %v803_v30  ;;  %v801_v35 = vmax.f32 %v683_v26, 0.0  ;;  %v694_v36 = vadd.f32 %v2630_v28, %v3001_v31  ;;  %v1084_v37 = vpack.c.bf16 %v1063_v32, %v1062_v27  ;;  %2735 = vmatprep.subr.bf16.mxu1 %v3070_v21  ;;  %v1459_v57 = vld [vmem:[#allocation3 + $0x32] sm:$0xff] }
 0x109   : > { %v1479_v38 = vpack.c.bf16 %v1458_v34, %v1457_v33  ;;  %v685_v39 = vpop.f32.mrf.mxu0 }
 0x10a   : > { %850 = vst.msk [vmem:[#allocation2 + $0xc0] sm:$0xff] %vm825_vm1, %v801_v35  ;;  %v804_v40 = vmax.f32 %v694_v36, 0.0  ;;  %v686_v41 = vadd.f32 %v3001_v31, %v685_v39  ;;  %2659 = vmatprep.mubr.msk.bf16.mxu1 %vm825_vm1, %v1084_v37 }
 0x10b   : > { %2715 = vmatprep.mubr.msk.bf16.mxu0 %vm825_vm1, %v1479_v38  ;;  %v896_v42 = vld [vmem:[#allocation2 + $0xb0] ss:$2 sm:$0xff]  ;;  %v944_v43 = vld [vmem:[#allocation2 + $0xb1] ss:$2 sm:$0xff]  ;;  %v2633_v44 = vpop.f32.mrf.mxu0 }
 0x10c   : > { %v980_v45 = vmax.f32 %v896_v42, %v944_v43  ;;  %853 = vst.msk [vmem:[#allocation2 + $0xd8] sm:$0xff] %vm825_vm1, %v804_v40  ;;  %v802_v46 = vmax.f32 %v686_v41, 0.0  ;;  %v707_v47 = vadd.f32 %v2633_v44, %v3001_v31 }
 0x10d   : > { %v894_v48 = vld [vmem:[#allocation2 + $0xa0] ss:$2 sm:$0xff]  ;;  %v942_v49 = vld [vmem:[#allocation2 + $0xa1] ss:$2 sm:$0xff]  ;;  %v698_v50 = vpop.f32.mrf.mxu0 }
 0x10e   : > { %1004 = vst.msk [vmem:[#allocation3 + $0x58] sm:$0xff] %vm825_vm1, %v980_v45  ;;  %v979_v51 = vmax.f32 %v894_v48, %v942_v49  ;;  %851 = vst.msk [vmem:[#allocation2 + $0xc8] sm:$0xff] %vm825_vm1, %v802_v46  ;;  %v807_v52 = vmax.f32 %v707_v47, 0.0  ;;  %v699_v53 = vadd.f32 %v3001_v31, %v698_v50 }
 0x10f   : > { %v2634_v55 = vpop.f32.mrf.mxu0  ;;  %v1065_v56 = vld [vmem:[#allocation3 + $0x39] sm:$0xff]  ;;  %v1066_v14 = vld [vmem:[#allocation3 + $0x41] sm:$0xff] }
 0x110   : > { %v1460_v58 = vld [vmem:[#allocation3 + $0x3a] sm:$0xff]  ;;  %1003 = vst.msk [vmem:[#allocation3 + $0x50] sm:$0xff] %vm825_vm1, %v979_v51  ;;  %856 = vst.msk [vmem:[#allocation2 + $0xf0] sm:$0xff] %vm825_vm1, %v807_v52  ;;  %v805_v59 = vmax.f32 %v699_v53, 0.0  ;;  %v710_v60 = vadd.f32 %v2634_v55, %v3001_v31  ;;  %v1085_v61 = vpack.c.bf16 %v1065_v56, %v1064_v54  ;;  %v1461_v17 = vld [vmem:[#allocation3 + $0x42] sm:$0xff] }
 0x111   : > { %v1480_v62 = vpack.c.bf16 %v1460_v58, %v1459_v57  ;;  %v701_v63 = vpop.f32.mrf.mxu0 }
 0x112   : > { %854 = vst.msk [vmem:[#allocation2 + $0xe0] sm:$0xff] %vm825_vm1, %v805_v59  ;;  %v808_v0 = vmax.f32 %v710_v60, 0.0  ;;  %v702_v1 = vadd.f32 %v3001_v31, %v701_v63  ;;  %2660 = vmatmul.mubr.msk.bf16.gmra.mxu1 %vm825_vm1, %v1085_v61 }
 0x113   : > { %2716 = vmatmul.mubr.msk.bf16.gmra.mxu0 %vm825_vm1, %v1480_v62  ;;  %v900_v2 = vld [vmem:[#allocation2 + $0xd0] ss:$2 sm:$0xff]  ;;  %v948_v3 = vld [vmem:[#allocation2 + $0xd1] ss:$2 sm:$0xff]  ;;  %v2637_v4 = vpop.f32.mrf.mxu0 }
 0x114   : > { %v982_v5 = vmax.f32 %v900_v2, %v948_v3  ;;  %857 = vst.msk [vmem:[#allocation2 + $0xf8] sm:$0xff] %vm825_vm1, %v808_v0  ;;  %v806_v6 = vmax.f32 %v702_v1, 0.0  ;;  %v723_v7 = vadd.f32 %v2637_v4, %v3001_v31 }
 0x115   : > { %v898_v8 = vld [vmem:[#allocation2 + $0xc0] ss:$2 sm:$0xff]  ;;  %v946_v9 = vld [vmem:[#allocation2 + $0xc1] ss:$2 sm:$0xff]  ;;  %v714_v10 = vpop.f32.mrf.mxu0 }
 0x116   : > { %1006 = vst.msk [vmem:[#allocation3 + $0x68] sm:$0xff] %vm825_vm1, %v982_v5  ;;  %v981_v11 = vmax.f32 %v898_v8, %v946_v9  ;;  %855 = vst.msk [vmem:[#allocation2 + $0xe8] sm:$0xff] %vm825_vm1, %v806_v6  ;;  %v811_v12 = vmax.f32 %v723_v7, 0.0  ;;  %v715_v13 = vadd.f32 %v3001_v31, %v714_v10 }
 0x117   : > { %v2638_v15 = vpop.f32.mrf.mxu0  ;;  %v1067_v16 = vld [vmem:[#allocation3 + $0x49] sm:$0xff]  ;;  %v1068_v41 = vld [vmem:[#allocation3 + $0x51] sm:$0xff] }
 0x118   : > { %v1462_v18 = vld [vmem:[#allocation3 + $0x4a] sm:$0xff]  ;;  %1005 = vst.msk [vmem:[#allocation3 + $0x60] sm:$0xff] %vm825_vm1, %v981_v11  ;;  %860 = vst.msk [vmem:[#allocation2 + $0x110] sm:$0xff] %vm825_vm1, %v811_v12  ;;  %v809_v19 = vmax.f32 %v715_v13, 0.0  ;;  %v726_v20 = vadd.f32 %v2638_v15, %v3001_v31  ;;  %v1086_v22 = vpack.c.bf16 %v1067_v16, %v1066_v14  ;;  %v1463_v44 = vld [vmem:[#allocation3 + $0x52] sm:$0xff] }
 0x119   : > { %v1481_v23 = vpack.c.bf16 %v1462_v18, %v1461_v17  ;;  %v717_v24 = vpop.f32.mrf.mxu0 }
 0x11a   : > { %858 = vst.msk [vmem:[#allocation2 + $0x100] sm:$0xff] %vm825_vm1, %v809_v19  ;;  %v812_v25 = vmax.f32 %v726_v20, 0.0  ;;  %v718_v30 = vadd.f32 %v3001_v31, %v717_v24  ;;  %2663 = vmatprep.mubr.msk.bf16.mxu1 %vm825_vm1, %v1086_v22 }
 0x11b   : > { %2719 = vmatprep.mubr.msk.bf16.mxu0 %vm825_vm1, %v1481_v23  ;;  %v904_v26 = vld [vmem:[#allocation2 + $0xf0] ss:$2 sm:$0xff]  ;;  %v952_v27 = vld [vmem:[#allocation2 + $0xf1] ss:$2 sm:$0xff]  ;;  %v2641_v28 = vpop.f32.mrf.mxu0 }
 0x11c   : > { %v984_v32 = vmax.f32 %v904_v26, %v952_v27  ;;  %861 = vst.msk [vmem:[#allocation2 + $0x118] sm:$0xff] %vm825_vm1, %v812_v25  ;;  %v810_v33 = vmax.f32 %v718_v30, 0.0  ;;  %v739_v34 = vadd.f32 %v2641_v28, %v3001_v31 }
 0x11d   : > { %v902_v35 = vld [vmem:[#allocation2 + $0xe0] ss:$2 sm:$0xff]  ;;  %v950_v36 = vld [vmem:[#allocation2 + $0xe1] ss:$2 sm:$0xff]  ;;  %v730_v37 = vpop.f32.mrf.mxu0 }
 0x11e   : > { %1008 = vst.msk [vmem:[#allocation3 + $0x78] sm:$0xff] %vm825_vm1, %v984_v32  ;;  %v983_v38 = vmax.f32 %v902_v35, %v950_v36  ;;  %859 = vst.msk [vmem:[#allocation2 + $0x108] sm:$0xff] %vm825_vm1, %v810_v33  ;;  %v815_v39 = vmax.f32 %v739_v34, 0.0  ;;  %v731_v40 = vadd.f32 %v3001_v31, %v730_v37 }
 0x11f   : > { %v2642_v42 = vpop.f32.mrf.mxu0  ;;  %v1069_v43 = vld [vmem:[#allocation3 + $0x59] sm:$0xff]  ;;  %v1070_v1 = vld [vmem:[#allocation3 + $0x61] sm:$0xff] }
 0x120   : > { %v1464_v45 = vld [vmem:[#allocation3 + $0x5a] sm:$0xff]  ;;  %1007 = vst.msk [vmem:[#allocation3 + $0x70] sm:$0xff] %vm825_vm1, %v983_v38  ;;  %864 = vst.msk [vmem:[#allocation2 + $0x130] sm:$0xff] %vm825_vm1, %v815_v39  ;;  %v813_v46 = vmax.f32 %v731_v40, 0.0  ;;  %v742_v47 = vadd.f32 %v2642_v42, %v3001_v31  ;;  %v1087_v48 = vpack.c.bf16 %v1069_v43, %v1068_v41  ;;  %v1465_v4 = vld [vmem:[#allocation3 + $0x62] sm:$0xff] }
 0x121   : > { %v1482_v49 = vpack.c.bf16 %v1464_v45, %v1463_v44  ;;  %v733_v50 = vpop.f32.mrf.mxu0 }
 0x122   : > { %862 = vst.msk [vmem:[#allocation2 + $0x120] sm:$0xff] %vm825_vm1, %v813_v46  ;;  %v816_v51 = vmax.f32 %v742_v47, 0.0  ;;  %v734_v52 = vadd.f32 %v3001_v31, %v733_v50  ;;  %2664 = vmatmul.mubr.msk.bf16.gmra.mxu1 %vm825_vm1, %v1087_v48 }
 0x123   : > { %2720 = vmatmul.mubr.msk.bf16.gmra.mxu0 %vm825_vm1, %v1482_v49  ;;  %v908_v53 = vld [vmem:[#allocation2 + $0x110] ss:$2 sm:$0xff]  ;;  %v956_v54 = vld [vmem:[#allocation2 + $0x111] ss:$2 sm:$0xff]  ;;  %v2645_v55 = vpop.f32.mrf.mxu0 }
 0x124   : > { %v986_v56 = vmax.f32 %v908_v53, %v956_v54  ;;  %865 = vst.msk [vmem:[#allocation2 + $0x138] sm:$0xff] %vm825_vm1, %v816_v51  ;;  %v814_v57 = vmax.f32 %v734_v52, 0.0  ;;  %v755_v58 = vadd.f32 %v2645_v55, %v3001_v31 }
 0x125   : > { %v906_v59 = vld [vmem:[#allocation2 + $0x100] ss:$2 sm:$0xff]  ;;  %v954_v60 = vld [vmem:[#allocation2 + $0x101] ss:$2 sm:$0xff]  ;;  %v746_v61 = vpop.f32.mrf.mxu0 }
 0x126   : > { %1010 = vst.msk [vmem:[#allocation3 + $0x88] sm:$0xff] %vm825_vm1, %v986_v56  ;;  %v985_v62 = vmax.f32 %v906_v59, %v954_v60  ;;  %863 = vst.msk [vmem:[#allocation2 + $0x128] sm:$0xff] %vm825_vm1, %v814_v57  ;;  %v819_v63 = vmax.f32 %v755_v58, 0.0  ;;  %v747_v0 = vadd.f32 %v3001_v31, %v746_v61 }
 0x127   : > { %v2646_v2 = vpop.f32.mrf.mxu0  ;;  %v1071_v3 = vld [vmem:[#allocation3 + $0x69] sm:$0xff]  ;;  %v1072_v30 = vld [vmem:[#allocation3 + $0x71] sm:$0xff] }
 0x128   : > { %v1466_v5 = vld [vmem:[#allocation3 + $0x6a] sm:$0xff]  ;;  %1009 = vst.msk [vmem:[#allocation3 + $0x80] sm:$0xff] %vm825_vm1, %v985_v62  ;;  %868 = vst.msk [vmem:[#allocation2 + $0x150] sm:$0xff] %vm825_vm1, %v819_v63  ;;  %v817_v6 = vmax.f32 %v747_v0, 0.0  ;;  %v758_v7 = vadd.f32 %v2646_v2, %v3001_v31  ;;  %v1088_v8 = vpack.c.bf16 %v1071_v3, %v1070_v1  ;;  %v1467_v28 = vld [vmem:[#allocation3 + $0x72] sm:$0xff] }
 0x129   : > { %v1483_v9 = vpack.c.bf16 %v1466_v5, %v1465_v4  ;;  %v749_v10 = vpop.f32.mrf.mxu0  ;;  %v1018_v0 = vld [vmem:[#allocation3] sm:$0xff] }
 0x12a   : > { %866 = vst.msk [vmem:[#allocation2 + $0x140] sm:$0xff] %vm825_vm1, %v817_v6  ;;  %v820_v11 = vmax.f32 %v758_v7, 0.0  ;;  %v750_v12 = vadd.f32 %v3001_v31, %v749_v10  ;;  %2667 = vmatprep.mubr.msk.bf16.mxu1 %vm825_vm1, %v1088_v8 }
 0x12b   : > { %2723 = vmatprep.mubr.msk.bf16.mxu0 %vm825_vm1, %v1483_v9  ;;  %v912_v13 = vld [vmem:[#allocation2 + $0x130] ss:$2 sm:$0xff]  ;;  %v960_v14 = vld [vmem:[#allocation2 + $0x131] ss:$2 sm:$0xff]  ;;  %v2649_v15 = vpop.f32.mrf.mxu0 }
 0x12c   : > { %v988_v16 = vmax.f32 %v912_v13, %v960_v14  ;;  %869 = vst.msk [vmem:[#allocation2 + $0x158] sm:$0xff] %vm825_vm1, %v820_v11  ;;  %v818_v17 = vmax.f32 %v750_v12, 0.0  ;;  %v771_v18 = vadd.f32 %v2649_v15, %v3001_v31  ;;  %v1019_v13 = vld [vmem:[#allocation3 + $0x8] sm:$0xff]  ;;  %v1020_v15 = vld [vmem:[#allocation3 + $0x10] sm:$0xff] }
 0x12d   : > { %v910_v19 = vld [vmem:[#allocation2 + $0x120] ss:$2 sm:$0xff]  ;;  %v958_v20 = vld [vmem:[#allocation2 + $0x121] ss:$2 sm:$0xff]  ;;  %v762_v22 = vpop.f32.mrf.mxu0  ;;  %v1042_v14 = vpack.c.bf16 %v1019_v13, %v1018_v0 }
 0x12e   : > { %1012 = vst.msk [vmem:[#allocation3 + $0x98] sm:$0xff] %vm825_vm1, %v988_v16  ;;  %v987_v23 = vmax.f32 %v910_v19, %v958_v20  ;;  %867 = vst.msk [vmem:[#allocation2 + $0x148] sm:$0xff] %vm825_vm1, %v818_v17  ;;  %v823_v24 = vmax.f32 %v771_v18, 0.0  ;;  %v763_v25 = vadd.f32 %v3001_v31, %v762_v22  ;;  %v1022_v16 = vld [vmem:[#allocation3 + $0x20] sm:$0xff]  ;;  %v1021_v17 = vld [vmem:[#allocation3 + $0x18] sm:$0xff] }
 0x12f   : > { %v2650_v26 = vpop.f32.mrf.mxu0  ;;  %v1073_v27 = vld [vmem:[#allocation3 + $0x79] sm:$0xff]  ;;  %v1074_v47 = vld [vmem:[#allocation3 + $0x81] sm:$0xff]  ;;  %v1043_v18 = vpack.c.bf16 %v1021_v17, %v1020_v15  ;;  %v2853_v20 = vld [vmem:[%s3449_s2 + $0x30] sm:$0xff]  }
 0x130   : > { %v1468_v32 = vld [vmem:[#allocation3 + $0x7a] sm:$0xff]  ;;  %1011 = vst.msk [vmem:[#allocation3 + $0x90] sm:$0xff] %vm825_vm1, %v987_v23  ;;  %872 = vst.msk [vmem:[#allocation2 + $0x170] sm:$0xff] %vm825_vm1, %v823_v24  ;;  %v821_v33 = vmax.f32 %v763_v25, 0.0  ;;  %v774_v34 = vadd.f32 %v2650_v26, %v3001_v31  ;;  %v1089_v35 = vpack.c.bf16 %v1073_v27, %v1072_v30  ;;  %v1023_v19 = vld [vmem:[#allocation3 + $0x28] sm:$0xff] }
 0x131   : > { %v1484_v36 = vpack.c.bf16 %v1468_v32, %v1467_v28  ;;  %v765_v37 = vpop.f32.mrf.mxu0  ;;  %v1044_v22 = vpack.c.bf16 %v1023_v19, %v1022_v16  ;;  %v1024_v23 = vld [vmem:[#allocation3 + $0x30] sm:$0xff]  ;;  %v1026_v24 = vld [vmem:[#allocation3 + $0x40] sm:$0xff]  ;;  %v1025_v25 = vld [vmem:[#allocation3 + $0x38] sm:$0xff] }
 0x132   : > { %870 = vst.msk [vmem:[#allocation2 + $0x160] sm:$0xff] %vm825_vm1, %v821_v33  ;;  %v824_v38 = vmax.f32 %v774_v34, 0.0  ;;  %v766_v39 = vadd.f32 %v3001_v31, %v765_v37  ;;  %2668 = vmatmul.mubr.msk.bf16.gmra.mxu1 %vm825_vm1, %v1089_v35  ;;  %v1469_v31 = vld [vmem:[#allocation3 + $0x82] sm:$0xff]  ;;  %v1045_v30 = vpack.c.bf16 %v1025_v25, %v1024_v23  ;;  %v1028_v28 = vld [vmem:[#allocation3 + $0x50] sm:$0xff]  ;;  %v1029_v33 = vld [vmem:[#allocation3 + $0x58] sm:$0xff] }
 0x133   : > { %2724 = vmatmul.mubr.msk.bf16.gmra.mxu0 %vm825_vm1, %v1484_v36  ;;  %v916_v40 = vld [vmem:[#allocation2 + $0x150] ss:$2 sm:$0xff]  ;;  %v964_v41 = vld [vmem:[#allocation2 + $0x151] ss:$2 sm:$0xff]  ;;  %v1027_v26 = vld [vmem:[#allocation3 + $0x48] sm:$0xff]  ;;  %v1047_v34 = vpack.c.bf16 %v1029_v33, %v1028_v28 }
 0x134   : > { %v990_v42 = vmax.f32 %v916_v40, %v964_v41  ;;  %873 = vst.msk [vmem:[#allocation2 + $0x178] sm:$0xff] %vm825_vm1, %v824_v38  ;;  %v822_v43 = vmax.f32 %v766_v39, 0.0  ;;  %v1046_v27 = vpack.c.bf16 %v1027_v26, %v1026_v24  ;;  %v1030_v32 = vld [vmem:[#allocation3 + $0x60] sm:$0xff]  ;;  %v1031_v35 = vld [vmem:[#allocation3 + $0x68] sm:$0xff]  ;;  %v1032_v36 = vld [vmem:[#allocation3 + $0x70] sm:$0xff] }
 0x135   : > { %v914_v44 = vld [vmem:[#allocation2 + $0x140] ss:$2 sm:$0xff]  ;;  %v962_v45 = vld [vmem:[#allocation2 + $0x141] ss:$2 sm:$0xff]  ;;  %v1033_v38 = vld [vmem:[#allocation3 + $0x78] sm:$0xff] }
 0x136   : > { %1014 = vst.msk [vmem:[#allocation3 + $0xa8] sm:$0xff] %vm825_vm1, %v990_v42  ;;  %v989_v46 = vmax.f32 %v914_v44, %v962_v45  ;;  %871 = vst.msk [vmem:[#allocation2 + $0x168] sm:$0xff] %vm825_vm1, %v822_v43  ;;  %v1034_v37 = vld [vmem:[#allocation3 + $0x80] sm:$0xff]  ;;  %v1049_v39 = vpack.c.bf16 %v1033_v38, %v1032_v36  ;;  %v1035_v40 = vld [vmem:[#allocation3 + $0x88] sm:$0xff] }
 0x137   : > { %v1075_v48 = vld [vmem:[#allocation3 + $0x89] sm:$0xff]  ;;  %v1076_v58 = vld [vmem:[#allocation3 + $0x91] sm:$0xff]  ;;  %v1050_v41 = vpack.c.bf16 %v1035_v40, %v1034_v37 }
 0x138   : > { %v1470_v49 = vld [vmem:[#allocation3 + $0x8a] sm:$0xff]  ;;  %1013 = vst.msk [vmem:[#allocation3 + $0xa0] sm:$0xff] %vm825_vm1, %v989_v46  ;;  %v1090_v50 = vpack.c.bf16 %v1075_v48, %v1074_v47  ;;  %v1471_v60 = vld [vmem:[#allocation3 + $0x92] sm:$0xff] }
 0x139   : > { %v1485_v51 = vpack.c.bf16 %v1470_v49, %v1469_v31  ;;  %v1036_v42 = vld [vmem:[#allocation3 + $0x90] sm:$0xff]  ;;  %v1037_v44 = vld [vmem:[#allocation3 + $0x98] sm:$0xff] }
 0x13a   : > { %2671 = vmatprep.mubr.msk.bf16.mxu1 %vm825_vm1, %v1090_v50  ;;  %v1051_v45 = vpack.c.bf16 %v1037_v44, %v1036_v42  ;;  %v1696_v31 = vld [vmem:[#allocation3 + $0xb] sm:$0xff]  ;;  %v1713_v15 = vld [vmem:[#allocation3 + $0x93] sm:$0xff] }
 0x13b   : > { %2727 = vmatprep.mubr.msk.bf16.mxu0 %vm825_vm1, %v1485_v51  ;;  %v920_v52 = vld [vmem:[#allocation2 + $0x170] ss:$2 sm:$0xff]  ;;  %v968_v53 = vld [vmem:[#allocation2 + $0x171] ss:$2 sm:$0xff]  ;;  %v1695_v51 = vld [vmem:[#allocation3 + $0x3] sm:$0xff] }
 0x13c   : > { %v992_v54 = vmax.f32 %v920_v52, %v968_v53  ;;  %v1719_v52 = vpack.c.bf16 %v1696_v31, %v1695_v51  ;;  %v1698_v53 = vld [vmem:[#allocation3 + $0x1b] sm:$0xff] }
 0x13d   : > { %v918_v55 = vld [vmem:[#allocation2 + $0x160] ss:$2 sm:$0xff]  ;;  %v966_v56 = vld [vmem:[#allocation2 + $0x161] ss:$2 sm:$0xff] }
 0x13e   : > { %1016 = vst.msk [vmem:[#allocation3 + $0xb8] sm:$0xff] %vm825_vm1, %v992_v54  ;;  %v991_v57 = vmax.f32 %v918_v55, %v966_v56  ;;  %v1039_v46 = vld [vmem:[#allocation3 + $0xa8] sm:$0xff]  ;;  %v1697_v55 = vld [vmem:[#allocation3 + $0x13] sm:$0xff] }
 0x13f   : > { %v1077_v59 = vld [vmem:[#allocation3 + $0x99] sm:$0xff]  ;;  %v1078_v1 = vld [vmem:[#allocation3 + $0xa1] sm:$0xff]  ;;  %v1700_v54 = vld [vmem:[#allocation3 + $0x2b] sm:$0xff]  ;;  %v1720_v56 = vpack.c.bf16 %v1698_v53, %v1697_v55 }
 0x140   : > { %v1472_v61 = vld [vmem:[#allocation3 + $0x9a] sm:$0xff]  ;;  %1015 = vst.msk [vmem:[#allocation3 + $0xb0] sm:$0xff] %vm825_vm1, %v991_v57  ;;  %v1091_v62 = vpack.c.bf16 %v1077_v59, %v1076_v58  ;;  %v1473_v2 = vld [vmem:[#allocation3 + $0xa2] sm:$0xff] }
 0x141   : > { %v1486_v63 = vpack.c.bf16 %v1472_v61, %v1471_v60  ;;  %v1038_v43 = vld [vmem:[#allocation3 + $0xa0] sm:$0xff]  ;;  %v1704_v60 = vld [vmem:[#allocation3 + $0x4b] sm:$0xff]  ;;  %v1701_v61 = vld [vmem:[#allocation3 + $0x33] sm:$0xff] }
 0x142   : > { %2672 = vmatmul.mubr.msk.bf16.gmra.mxu1 %vm825_vm1, %v1091_v62  ;;  %v1052_v47 = vpack.c.bf16 %v1039_v46, %v1038_v43  ;;  %v1699_v57 = vld [vmem:[#allocation3 + $0x23] sm:$0xff]  ;;  %v1702_v59 = vld [vmem:[#allocation3 + $0x3b] sm:$0xff] }
 0x143   : > { %2728 = vmatmul.mubr.msk.bf16.gmra.mxu0 %vm825_vm1, %v1486_v63  ;;  %v1721_v58 = vpack.c.bf16 %v1700_v54, %v1699_v57  ;;  %v1722_v62 = vpack.c.bf16 %v1702_v59, %v1701_v61  ;;  %v1703_v63 = vld [vmem:[#allocation3 + $0x43] sm:$0xff]  ;;  %v1714_v13 = vld [vmem:[#allocation3 + $0x9b] sm:$0xff] }
 0x144   : > { %v1723_v0 = vpack.c.bf16 %v1704_v60, %v1703_v63  ;;  %v1728_v16 = vpack.c.bf16 %v1714_v13, %v1713_v15  ;;  %v1715_v17 = vld [vmem:[#allocation3 + $0xa3] sm:$0xff] }
 0x145   : > { %v1081_v3 = vld [vmem:[#allocation3 + $0xb9] sm:$0xff]  ;;  %v2855_v53 = vld [vmem:[%s3450_s3 + $0x8] sm:$0xff]  }
 0x146   : > { %v1476_v11 = vld [vmem:[#allocation3 + $0xba] sm:$0xff] }
 0x147   : > { %v1079_v4 = vld [vmem:[#allocation3 + $0xa9] sm:$0xff]  ;;  %v1080_v6 = vld [vmem:[#allocation3 + $0xb1] sm:$0xff]  ;;  %v2856_v57 = vld [vmem:[%s3450_s3] sm:$0xff]  }
 0x148   : > { %v1474_v5 = vld [vmem:[#allocation3 + $0xaa] sm:$0xff]  ;;  %v1092_v7 = vpack.c.bf16 %v1079_v4, %v1078_v1  ;;  %v1093_v9 = vpack.c.bf16 %v1081_v3, %v1080_v6  ;;  %v1475_v10 = vld [vmem:[#allocation3 + $0xb2] sm:$0xff]  ;;  %v1706_v1 = vld [vmem:[#allocation3 + $0x5b] sm:$0xff] }
 0x149   : > { %v1487_v8 = vpack.c.bf16 %v1474_v5, %v1473_v2  ;;  %v1488_v12 = vpack.c.bf16 %v1476_v11, %v1475_v10  ;;  %v1040_v48 = vld [vmem:[#allocation3 + $0xb0] sm:$0xff]  ;;  %v1041_v49 = vld [vmem:[#allocation3 + $0xb8] sm:$0xff]  ;;  %v1707_v5 = vld [vmem:[#allocation3 + $0x63] sm:$0xff] }
 0x14a   : > { %2675 = vmatprep.mubr.msk.bf16.mxu1 %vm825_vm1, %v1092_v7  ;;  %v1053_v50 = vpack.c.bf16 %v1041_v49, %v1040_v48  ;;  %v1708_v2 = vld [vmem:[#allocation3 + $0x6b] sm:$0xff]  ;;  %v1705_v3 = vld [vmem:[#allocation3 + $0x53] sm:$0xff]  ;;  %v1710_v7 = vld [vmem:[#allocation3 + $0x7b] sm:$0xff] }
 0x14b   : > { %2731 = vmatprep.mubr.msk.bf16.mxu0 %vm825_vm1, %v1487_v8  ;;  %2676 = vmatmul.mubr.msk.bf16.gmra.mxu1 %vm825_vm1, %v1093_v9  ;;  %v1724_v4 = vpack.c.bf16 %v1706_v1, %v1705_v3  ;;  %v1725_v6 = vpack.c.bf16 %v1708_v2, %v1707_v5  ;;  %v1712_v8 = vld [vmem:[#allocation3 + $0x8b] sm:$0xff]  ;;  %v1709_v9 = vld [vmem:[#allocation3 + $0x73] sm:$0xff]  ;;  %v1711_v11 = vld [vmem:[#allocation3 + $0x83] sm:$0xff] }
 0x14c   : > { %2732 = vmatmul.mubr.msk.bf16.gmra.mxu0 %vm825_vm1, %v1488_v12  ;;  %2683 = vmatprep.mubr.msk.bf16.mxu1 %vm825_vm1, %v1042_v14  ;;  %v1726_v10 = vpack.c.bf16 %v1710_v7, %v1709_v9  ;;  %v1727_v12 = vpack.c.bf16 %v1712_v8, %v1711_v11  ;;  %v1716_v14 = vld [vmem:[#allocation3 + $0xab] sm:$0xff]  ;;  %v1717_v19 = vld [vmem:[#allocation3 + $0xb3] sm:$0xff] }
 0x14d   : > { %2787 = vmatprep.mubr.msk.f32.mxu0 %vm2869_vm2, %v3455_v29 }
 0x153   : > { %2684 = vmatmul.mubr.msk.bf16.vlgmr.msra.gmra.mxu1 %vm825_vm1, %v1043_v18  ;;  %v1729_v18 = vpack.c.bf16 %v1716_v14, %v1715_v17 }
 0x154   : > { %2687 = vmatprep.mubr.msk.bf16.mxu1 %vm825_vm1, %v1044_v22  ;;  %2736 = vmatpush3.bf16.msra.mxu1 %v3070_v21  ;;  %v1048_v21 = vpack.c.bf16 %v1031_v35, %v1030_v32 }
 0x155   : > { %2737 = vmatprep.subr.bf16.mxu1 %v2853_v20 }
 0x158   : > { %2738 = vmatpush3.bf16.msra.mxu1 %v2853_v20  ;;  %v1718_v20 = vld [vmem:[#allocation3 + $0xbb] sm:$0xff] }
 0x159   : > { %2790 = vmatprep.subr.bf16.mxu1 %v3455_v29  ;;  %v1730_v22 = vpack.c.bf16 %v1718_v20, %v1717_v19 }
 0x15b   : > { %2688 = vmatmul.mubr.msk.bf16.gmra.mxu1 %vm825_vm1, %v1045_v30 }
 0x15c   : > { %2691 = vmatprep.mubr.msk.bf16.mxu1 %vm825_vm1, %v1046_v27 }
 0x163   : > { %2692 = vmatmul.mubr.msk.bf16.gmra.mxu1 %vm825_vm1, %v1047_v34 }
 0x164   : > { %2695 = vmatprep.mubr.msk.bf16.mxu1 %vm825_vm1, %v1048_v21 }
 0x16b   : > { %2696 = vmatmul.mubr.msk.bf16.gmra.mxu1 %vm825_vm1, %v1049_v39 }
 0x16c   : > { %2699 = vmatprep.mubr.msk.bf16.mxu1 %vm825_vm1, %v1050_v41 }
 0x173   : > { %2700 = vmatmul.mubr.msk.bf16.gmra.mxu1 %vm825_vm1, %v1051_v45 }
 0x174   : > { %2703 = vmatprep.mubr.msk.bf16.mxu1 %vm825_vm1, %v1052_v47 }
 0x17b   : > { %2704 = vmatmul.mubr.msk.bf16.gmra.mxu1 %vm825_vm1, %v1053_v50  ;;  %v2854_v50 = vld [vmem:[%s3450_s3 + $0x10] ss:$0 sps:$4 sm:$0xff]  }
 0x17c   : > { %2739 = vmatprep.mubr.msk.bf16.mxu1 %vm825_vm1, %v1719_v52  ;;  %v2178_v52 = vsel %vm2176_vm3, %v2854_v50, 0 }
 0x183   : > { %2740 = vmatmul.mubr.msk.bf16.vlgmr.msra.gmra.mxu1 %vm825_vm1, %v1720_v56 }
 0x184   : > { %2743 = vmatprep.mubr.msk.bf16.mxu1 %vm825_vm1, %v1721_v58  ;;  %2791 = vmatpush3.bf16.msra.mxu1 %v2178_v52 }
 0x185   : > { %2792 = vmatprep.subr.bf16.mxu1 %v3455_v29 }
 0x188   : > { %2793 = vmatpush3.bf16.msra.mxu1 %v2855_v53 }
 0x189   : > { %2794 = vmatprep.subr.bf16.mxu1 %v3455_v29 }
 0x18b   : > { %2744 = vmatmul.mubr.msk.bf16.gmra.mxu1 %vm825_vm1, %v1722_v62 }
 0x18c   : > { %2747 = vmatprep.mubr.msk.bf16.mxu1 %vm825_vm1, %v1723_v0  ;;  %2795 = vmatpush3.bf16.msra.mxu1 %v2856_v57 }
 0x193   : > { %2748 = vmatmul.mubr.msk.bf16.gmra.mxu1 %vm825_vm1, %v1724_v4 }
 0x194   : > { %2751 = vmatprep.mubr.msk.bf16.mxu1 %vm825_vm1, %v1725_v6 }
 0x19b   : > { %2752 = vmatmul.mubr.msk.bf16.gmra.mxu1 %vm825_vm1, %v1726_v10 }
 0x19c   : > { %2755 = vmatprep.mubr.msk.bf16.mxu1 %vm825_vm1, %v1727_v12 }
 0x1a3   : > { %2756 = vmatmul.mubr.msk.bf16.gmra.mxu1 %vm825_vm1, %v1728_v16 }
 0x1a4   : > { %2759 = vmatprep.mubr.msk.bf16.mxu1 %vm825_vm1, %v1729_v18 }
 0x1ab   : > { %2760 = vmatmul.mubr.msk.bf16.gmra.mxu1 %vm825_vm1, %v1730_v22 }
 0x1ac   : > { %2796 = vmatprep.mubr.msk.bf16.mxu1 %vm2869_vm2, %v3455_v29 }
 0x1c2   : > { %v3186_v23 = vpop.f32.mrf.mxu1 }
 0x1c3   : > { %v2713_v54 = vpop.f32.mrf.mxu0 }
 0x1c4   : > { %v3188_v24 = vpop.f32.mrf.mxu1 }
 0x1c5   : > { %v1576_v58 = vpop.f32.mrf.mxu0 }
 0x1c6   : > { %v3190_v25 = vpop.f32.mrf.mxu1 }
 0x1c7   : > { %v2714_v61 = vpop.f32.mrf.mxu0 }
 0x1c8   : > { %v3192_v30 = vpop.f32.mrf.mxu1 }
 0x1c9   : > { %v1579_v0 = vpop.f32.mrf.mxu0 }
 0x1d2   : > { %v3194_v26 = vpop.f32.mrf.mxu1 }
 0x1d3   : > { %v2717_v2 = vpop.f32.mrf.mxu0 }
 0x1d4   : > { %v3196_v27 = vpop.f32.mrf.mxu1 }
 0x1d5   : > { %v1592_v5 = vpop.f32.mrf.mxu0 }
 0x1d6   : > { %v3198_v28 = vpop.f32.mrf.mxu1 }
 0x1d7   : > { %v2718_v8 = vpop.f32.mrf.mxu0 }
 0x1d8   : > { %v3200_v32 = vpop.f32.mrf.mxu1 }
 0x1d9   : > { %v3268_v11 = vpop.f32.mrf.mxu0 }
 0x1e2   : > { %v3202_v33 = vpop.f32.mrf.mxu1 }
 0x1e3   : > { %v3272_v13 = vpop.f32.mrf.mxu0 }
 0x1e4   : > { %v3204_v34 = vpop.f32.mrf.mxu1 }
 0x1e5   : > { %v3278_v16 = vpop.f32.mrf.mxu0 }
 0x1e6   : > { %v3206_v35 = vpop.f32.mrf.mxu1 }
 0x1e7   : > { %v3285_v20 = vpop.f32.mrf.mxu0 }
 0x1e8   : > { %v3208_v21 = vpop.f32.mrf.mxu1 }
 0x1e9   : > { %v3293_v29 = vpop.f32.mrf.mxu0 }
 0x1f2   : > { %v3210_v36 = vpop.f32.mrf.mxu1 }
 0x1f4   : > { %v3212_v37 = vpop.f32.mrf.mxu1 }
 0x1f6   : > { %v3214_v38 = vpop.f32.mrf.mxu1 }
 0x1f8   : > { %v3216_v39 = vpop.f32.mrf.mxu1 }
 0x202   : > { %v3218_v40 = vpop.f32.mrf.mxu1 }
 0x204   : > { %v3220_v41 = vpop.f32.mrf.mxu1 }
 0x206   : > { %v3222_v42 = vpop.f32.mrf.mxu1 }
 0x208   : > { %v3224_v43 = vpop.f32.mrf.mxu1 }
 0x20b   : > { %v3226_v44 = vpop.f32.mrf.mxu1 }
 0x20c   : > { %3457 = vst [vmem:[#allocation5_spill] sm:$0xff] %v3226_v44 }
 0x20d   : > { %v3228_v45 = vpop.f32.mrf.mxu1 }
 0x20e   : > { %3458 = vst [vmem:[#allocation6_spill] sm:$0xff] %v3228_v45 }
 0x20f   : > { %v3230_v46 = vpop.f32.mrf.mxu1 }
 0x210   : > { %3459 = vst [vmem:[#allocation7_spill] sm:$0xff] %v3230_v46 }
 0x211   : > { %v3232_v47 = vpop.f32.mrf.mxu1 }
 0x212   : > { %3460 = vst [vmem:[#allocation8_spill] sm:$0xff] %v3232_v47  ;;  %v3298_v47 = vld [vmem:[%s3452_s5 + $0x1] ss:$0 sm:$0xff] }
 0x213   : > { %v2685_v48 = vpop.f32.mrf.mxu1 }
 0x214   : > { %v1367_v19 = vadd.f32 %v2685_v48, %v3186_v23 }
 0x215   : > { %v1358_v31 = vpop.f32.mrf.mxu1 }
 0x216   : > { %v1359_v50 = vadd.f32 %v1358_v31, %v3188_v24  ;;  %v1673_v57 = vadd.f32 %v2713_v54, %v1367_v19 }
 0x217   : > { %v2686_v49 = vpop.f32.mrf.mxu1 }
 0x218   : > { %v1370_v53 = vadd.f32 %v2686_v49, %v3190_v25 }
 0x219   : > { %v1361_v51 = vpop.f32.mrf.mxu1 }
 0x21a   : > { %v1362_v23 = vadd.f32 %v1361_v51, %v3192_v30  ;;  %v1674_v54 = vadd.f32 %v2714_v61, %v1370_v53 }
 0x21b   : > { %v2689_v55 = vpop.f32.mrf.mxu1 }
 0x21c   : > { %v1383_v24 = vadd.f32 %v2689_v55, %v3194_v26  ;;  %v1672_v30 = vadd.f32 %v1579_v0, %v1362_v23 }
 0x21d   : > { %v1374_v56 = vpop.f32.mrf.mxu1 }
 0x21e   : > { %v1375_v19 = vadd.f32 %v1374_v56, %v3196_v27 }
 0x21f   : > { %v2690_v59 = vpop.f32.mrf.mxu1 }
 0x220   : > { %v1386_v26 = vadd.f32 %v2690_v59, %v3198_v28  ;;  %v1675_v56 = vadd.f32 %v1592_v5, %v1375_v19 }
 0x221   : > { %v1377_v60 = vpop.f32.mrf.mxu1 }
 0x222   : > { %v1678_v5 = vadd.f32 %v2718_v8, %v1386_v26 }
 0x223   : > { %v3250_v62 = vpop.f32.mrf.mxu1 }
 0x224   : > { %v1399_v28 = vadd.f32 %v3250_v62, %v3202_v33 }
 0x225   : > { %v3252_v63 = vpop.f32.mrf.mxu1 }
 0x227   : > { %v3254_v1 = vpop.f32.mrf.mxu1 }
 0x229   : > { %v3256_v3 = vpop.f32.mrf.mxu1 }
 0x22b   : > { %v3258_v4 = vpop.f32.mrf.mxu1 }
 0x22d   : > { %v3260_v6 = vpop.f32.mrf.mxu1 }
 0x22f   : > { %v3262_v7 = vpop.f32.mrf.mxu1 }
 0x231   : > { %v3264_v9 = vpop.f32.mrf.mxu1 }
 0x233   : > { %v3266_v10 = vpop.f32.mrf.mxu1 }
 0x235   : > { %v3270_v12 = vpop.f32.mrf.mxu1 }
 0x237   : > { %v3274_v14 = vpop.f32.mrf.mxu1 }
 0x239   : > { %v3276_v15 = vpop.f32.mrf.mxu1 }
 0x23b   : > { %v3280_v17 = vpop.f32.mrf.mxu1 }
 0x23c   : > { %3461 = vst [vmem:[#allocation9_spill] sm:$0xff] %v3280_v17 }
 0x23d   : > { %v3282_v18 = vpop.f32.mrf.mxu1 }
 0x23e   : > { %3462 = vst [vmem:[#allocation10_spill] sm:$0xff] %v3282_v18  ;;  %v1671_v18 = vadd.f32 %v1576_v58, %v1359_v50  ;;  %v1677_v58 = vadd.f32 %v2717_v2, %v1383_v24  ;;  %v1378_v50 = vadd.f32 %v1377_v60, %v3200_v32  ;;  %v1391_v32 = vadd.f32 %v3252_v63, %v3204_v34 }
 0x23f   : > { %v3287_v22 = vpop.f32.mrf.mxu1 }
 0x240   : > { %3463 = vst [vmem:[#allocation11_spill] sm:$0xff] %v3287_v22  ;;  %v3301_v22 = vpop.f32.mrf.mxu0  ;;  %v1676_v33 = vadd.f32 %v3268_v11, %v1378_v50  ;;  %v1679_v19 = vadd.f32 %v3278_v16, %v1391_v32  ;;  %v1394_v11 = vadd.f32 %v3256_v3, %v3208_v21  ;;  %v1407_v21 = vadd.f32 %v3260_v6, %v3212_v37 }
 0x241   : > { %v3290_v52 = vpop.f32.mrf.mxu1 }
 0x242   : > { %3464 = vst [vmem:[#allocation12_spill] sm:$0xff] %v3290_v52 }
 0x243   : > { %v2741_v46 = vpop.f32.mrf.mxu1 }
 0x244   : > { %v1915_v48 = vadd.f32 %v2741_v46, %v1673_v57  ;;  %v3307_v46 = vpop.f32.mrf.mxu0 }
 0x245   : > { %v1818_v31 = vpop.f32.mrf.mxu1 }
 0x246   : > { %v1943_v25 = vadd.f32 %v3298_v47, %v1915_v48  ;;  %v1913_v49 = vadd.f32 %v1818_v31, %v1671_v18  ;;  %v3315_v57 = vpop.f32.mrf.mxu0  ;;  %v1681_v31 = vadd.f32 %v3272_v13, %v1399_v28  ;;  %v1683_v28 = vadd.f32 %v3307_v46, %v1407_v21 }
 0x247   : > { %v2742_v52 = vpop.f32.mrf.mxu1 }
 0x248   : > { %v1967_v45 = vmax.f32 %v1943_v25, 0.0  ;;  %v1941_v17 = vadd.f32 %v3298_v47, %v1913_v49  ;;  %v1916_v44 = vadd.f32 %v2742_v52, %v1674_v54  ;;  %v1627_v62 = vpop.f32.mrf.mxu0  ;;  %v1402_v25 = vadd.f32 %v3254_v1, %v3206_v35 }
 0x249   : > { %v1821_v51 = vpop.f32.mrf.mxu1  ;;  %v1415_v35 = vadd.f32 %v3258_v4, %v3210_v36  ;;  %v1680_v4 = vadd.f32 %v3293_v29, %v1394_v11 }
 0x24a   : > { %1992 = vst.msk [vmem:[#allocation4 + $0x10] sm:$0xff] %vm1989_vm4, %v1967_v45  ;;  %v1965_v55 = vmax.f32 %v1941_v17, 0.0  ;;  %v1944_v61 = vadd.f32 %v3298_v47, %v1916_v44  ;;  %v1914_v18 = vadd.f32 %v1821_v51, %v1672_v30  ;;  %v2729_v49 = vpop.f32.mrf.mxu0  ;;  %v1682_v16 = vadd.f32 %v3285_v20, %v1402_v25 }
 0x24b   : > { %v2745_v27 = vpop.f32.mrf.mxu1  ;;  %v1685_v50 = vadd.f32 %v3301_v22, %v1415_v35  ;;  %v3467_v35 = vld [vmem:[#allocation6_spill] sm:$0xff] }
 0x24c   : > { %1990 = vst.msk [vmem:[#allocation4] sm:$0xff] %vm1989_vm4, %v1965_v55  ;;  %v1968_v52 = vmax.f32 %v1944_v61, 0.0  ;;  %v1942_v0 = vadd.f32 %v3298_v47, %v1914_v18  ;;  %v1919_v53 = vadd.f32 %v2745_v27, %v1677_v58  ;;  %v1640_v61 = vpop.f32.mrf.mxu0 }
 0x24d   : > { %v1834_v45 = vpop.f32.mrf.mxu1 }
 0x24e   : > { %1993 = vst.msk [vmem:[#allocation4 + $0x18] sm:$0xff] %vm1989_vm4, %v1968_v52  ;;  %v1966_v44 = vmax.f32 %v1942_v0, 0.0  ;;  %v1947_v59 = vadd.f32 %v3298_v47, %v1919_v53  ;;  %v1917_v2 = vadd.f32 %v1834_v45, %v1675_v56  ;;  %v1418_v52 = vadd.f32 %v3262_v7, %v3214_v38  ;;  %v2730_v0 = vpop.f32.mrf.mxu0 }
 0x24f   : > { %v2746_v60 = vpop.f32.mrf.mxu1  ;;  %v1410_v45 = vadd.f32 %v3264_v9, %v3216_v39  ;;  %v1431_v38 = vadd.f32 %v3266_v10, %v3218_v40  ;;  %v1423_v39 = vadd.f32 %v3270_v12, %v3220_v41 }
 0x250   : > { %1991 = vst.msk [vmem:[#allocation4 + $0x8] sm:$0xff] %vm1989_vm4, %v1966_v44  ;;  %v1971_v17 = vmax.f32 %v1947_v59, 0.0  ;;  %v1945_v23 = vadd.f32 %v3298_v47, %v1917_v2  ;;  %v1920_v48 = vadd.f32 %v2746_v60, %v1678_v5  ;;  %v1686_v46 = vadd.f32 %v3315_v57, %v1418_v52  ;;  %v1643_v32 = vpop.f32.mrf.mxu0 }
 0x251   : > { %v1837_v24 = vpop.f32.mrf.mxu1  ;;  %v1684_v10 = vadd.f32 %v1627_v62, %v1410_v45  ;;  %v1687_v25 = vadd.f32 %v1640_v61, %v1423_v39 }
 0x252   : > { %1996 = vst.msk [vmem:[#allocation4 + $0x30] sm:$0xff] %vm1989_vm4, %v1971_v17  ;;  %v1969_v8 = vmax.f32 %v1945_v23, 0.0  ;;  %v1948_v34 = vadd.f32 %v3298_v47, %v1920_v48  ;;  %v1918_v63 = vadd.f32 %v1837_v24, %v1676_v33  ;;  %v1689_v48 = vadd.f32 %v2729_v49, %v1431_v38  ;;  %v2733_v41 = vpop.f32.mrf.mxu0  ;;  %v3465_v49 = vld [vmem:[#allocation5_spill] sm:$0xff] }
 0x253   : > { %v2749_v54 = vpop.f32.mrf.mxu1  ;;  %v1434_v33 = vadd.f32 %v3274_v14, %v3222_v42  ;;  %v3466_v42 = vld [vmem:[#allocation9_spill] sm:$0xff] }
 0x254   : > { %1994 = vst.msk [vmem:[#allocation4 + $0x20] sm:$0xff] %vm1989_vm4, %v1969_v8  ;;  %v1972_v30 = vmax.f32 %v1948_v34, 0.0  ;;  %v1946_v13 = vadd.f32 %v3298_v47, %v1918_v63  ;;  %v1923_v51 = vadd.f32 %v2749_v54, %v1681_v31  ;;  %v1426_v8 = vadd.f32 %v3276_v15, %v3224_v43  ;;  %v3468_v43 = vld [vmem:[#allocation10_spill] sm:$0xff] }
 0x255   : > { %v1850_v1 = vpop.f32.mrf.mxu1  ;;  %v1447_v14 = vadd.f32 %v3466_v42, %v3465_v49  ;;  %v1439_v15 = vadd.f32 %v3468_v43, %v3467_v35 }
 0x256   : > { %1997 = vst.msk [vmem:[#allocation4 + $0x38] sm:$0xff] %vm1989_vm4, %v1972_v30  ;;  %v1970_v58 = vmax.f32 %v1946_v13, 0.0  ;;  %v1951_v26 = vadd.f32 %v3298_v47, %v1923_v51  ;;  %v1921_v55 = vadd.f32 %v1850_v1, %v1679_v19  ;;  %v1690_v13 = vadd.f32 %v2730_v0, %v1434_v33  ;;  %v1656_v51 = vpop.f32.mrf.mxu0 }
 0x257   : > { %v2750_v3 = vpop.f32.mrf.mxu1  ;;  %v1693_v21 = vadd.f32 %v2733_v41, %v1447_v14 }
 0x258   : > { %1995 = vst.msk [vmem:[#allocation4 + $0x28] sm:$0xff] %vm1989_vm4, %v1970_v58  ;;  %v1975_v18 = vmax.f32 %v1951_v26, 0.0  ;;  %v1949_v27 = vadd.f32 %v3298_v47, %v1921_v55  ;;  %v1924_v36 = vadd.f32 %v2750_v3, %v1682_v16  ;;  %v1688_v16 = vadd.f32 %v1643_v32, %v1426_v8  ;;  %v3469_v3 = vld [vmem:[#allocation7_spill] sm:$0xff] }
 0x259   : > { %v1853_v56 = vpop.f32.mrf.mxu1 }
 0x25a   : > { %2000 = vst.msk [vmem:[#allocation4 + $0x50] sm:$0xff] %vm1989_vm4, %v1975_v18  ;;  %v1973_v20 = vmax.f32 %v1949_v27, 0.0  ;;  %v1952_v37 = vadd.f32 %v3298_v47, %v1924_v36  ;;  %v1922_v6 = vadd.f32 %v1853_v56, %v1680_v4  ;;  %v3470_v18 = vld [vmem:[#allocation11_spill] sm:$0xff] }
 0x25b   : > { %v2753_v53 = vpop.f32.mrf.mxu1  ;;  %v1450_v27 = vadd.f32 %v3470_v18, %v3469_v3  ;;  %v2040_v3 = vld [vmem:[#allocation4 + $0x11] ss:$2 sm:$0xff] }
 0x25c   : > { %1998 = vst.msk [vmem:[#allocation4 + $0x40] sm:$0xff] %vm1989_vm4, %v1973_v20  ;;  %v1976_v29 = vmax.f32 %v1952_v37, 0.0  ;;  %v1950_v22 = vadd.f32 %v3298_v47, %v1922_v6  ;;  %v1927_v44 = vadd.f32 %v2753_v53, %v1685_v50  ;;  %v2734_v50 = vpop.f32.mrf.mxu0  ;;  %v1691_v20 = vadd.f32 %v1656_v51, %v1439_v15  ;;  %v3471_v37 = vld [vmem:[#allocation8_spill] sm:$0xff] }
 0x25d   : > { %v1866_v7 = vpop.f32.mrf.mxu1  ;;  %v3472_v6 = vld [vmem:[#allocation12_spill] sm:$0xff] }
 0x25e   : > { %2001 = vst.msk [vmem:[#allocation4 + $0x58] sm:$0xff] %vm1989_vm4, %v1976_v29  ;;  %v1974_v59 = vmax.f32 %v1950_v22, 0.0  ;;  %v1955_v2 = vadd.f32 %v3298_v47, %v1927_v44  ;;  %v1925_v5 = vadd.f32 %v1866_v7, %v1683_v28  ;;  %v1442_v0 = vadd.f32 %v3472_v6, %v3471_v37 }
 0x25f   : > { %v2754_v9 = vpop.f32.mrf.mxu1  ;;  %v1694_v7 = vadd.f32 %v2734_v50, %v1450_v27  ;;  %v2014_v27 = vld [vmem:[#allocation4] ss:$2 sm:$0xff]  ;;  %v2073_v50 = vld [vmem:[%s289_s17] sm:$0x3f] }
 0x260   : > { %1999 = vst.msk [vmem:[#allocation4 + $0x48] sm:$0xff] %vm1989_vm4, %v1974_v59  ;;  %v1979_v60 = vmax.f32 %v1955_v2, 0.0  ;;  %v1953_v17 = vadd.f32 %v3298_v47, %v1925_v5  ;;  %v1928_v40 = vadd.f32 %v2754_v9, %v1686_v46  ;;  %v1659_v59 = vpop.f32.mrf.mxu0 }
 0x261   : > { %v1869_v23 = vpop.f32.mrf.mxu1  ;;  %v1692_v39 = vadd.f32 %v1659_v59, %v1442_v0 }
 0x262   : > { %2004 = vst.msk [vmem:[#allocation4 + $0x70] sm:$0xff] %vm1989_vm4, %v1979_v60  ;;  %v1977_v57 = vmax.f32 %v1953_v17, 0.0  ;;  %v1956_v24 = vadd.f32 %v3298_v47, %v1928_v40  ;;  %v1926_v31 = vadd.f32 %v1869_v23, %v1684_v10 }
 0x263   : > { %v2757_v12 = vpop.f32.mrf.mxu1 }
 0x264   : > { %2002 = vst.msk [vmem:[#allocation4 + $0x60] sm:$0xff] %vm1989_vm4, %v1977_v57  ;;  %v1980_v62 = vmax.f32 %v1956_v24, 0.0  ;;  %v1954_v34 = vadd.f32 %v3298_v47, %v1926_v31  ;;  %v1931_v63 = vadd.f32 %v2757_v12, %v1689_v48 }
 0x265   : > { %v1882_v54 = vpop.f32.mrf.mxu1 }
 0x266   : > { %2005 = vst.msk [vmem:[#allocation4 + $0x78] sm:$0xff] %vm1989_vm4, %v1980_v62  ;;  %v1978_v19 = vmax.f32 %v1954_v34, 0.0  ;;  %v1959_v11 = vadd.f32 %v3298_v47, %v1931_v63  ;;  %v1929_v30 = vadd.f32 %v1882_v54, %v1687_v25  ;;  %v3473_v62 = vmov 0.0  }
 0x267   : > { %v2758_v1 = vpop.f32.mrf.mxu1  ;;  %v2022_v35 = vld [vmem:[#allocation4 + $0x40] ss:$2 sm:$0xff]  ;;  %v2046_v43 = vld [vmem:[#allocation4 + $0x41] ss:$2 sm:$0xff] }
 0x268   : > { %2003 = vst.msk [vmem:[#allocation4 + $0x68] sm:$0xff] %vm1989_vm4, %v1978_v19  ;;  %v1983_v58 = vmax.f32 %v1959_v11, 0.0  ;;  %v1957_v26 = vadd.f32 %v3298_v47, %v1929_v30  ;;  %v1932_v55 = vadd.f32 %v2758_v1, %v1690_v13  ;;  %v2024_v30 = vld [vmem:[#allocation4 + $0x50] ss:$2 sm:$0xff]  ;;  %v2048_v13 = vld [vmem:[#allocation4 + $0x51] ss:$2 sm:$0xff] }
 0x269   : > { %v1885_v61 = vpop.f32.mrf.mxu1  ;;  %v2066_v15 = vmax.f32 %v2024_v30, %v2048_v13  ;;  %v2020_v1 = vld [vmem:[#allocation4 + $0x30] ss:$2 sm:$0xff] }
 0x26a   : > { %2008 = vst.msk [vmem:[#allocation4 + $0x90] sm:$0xff] %vm1989_vm4, %v1983_v58  ;;  %v1981_v36 = vmax.f32 %v1957_v26, 0.0  ;;  %v1960_v4 = vadd.f32 %v3298_v47, %v1932_v55  ;;  %v1930_v56 = vadd.f32 %v1885_v61, %v1688_v16  ;;  %v2044_v58 = vld [vmem:[#allocation4 + $0x31] ss:$2 sm:$0xff]  ;;  %v2065_v26 = vmax.f32 %v2022_v35, %v2046_v43  ;;  %v2018_v55 = vld [vmem:[#allocation4 + $0x20] ss:$2 sm:$0xff] }
 0x26b   : > { %v2761_v52 = vpop.f32.mrf.mxu1  ;;  %v2042_v16 = vld [vmem:[#allocation4 + $0x21] ss:$2 sm:$0xff]  ;;  %v2064_v61 = vmax.f32 %v2020_v1, %v2044_v58 }
 0x26c   : > { %2006 = vst.msk [vmem:[#allocation4 + $0x80] sm:$0xff] %vm1989_vm4, %v1981_v36  ;;  %v1984_v53 = vmax.f32 %v1960_v4, 0.0  ;;  %v1958_v28 = vadd.f32 %v3298_v47, %v1930_v56  ;;  %v1935_v45 = vadd.f32 %v2761_v52, %v1693_v21  ;;  %v2016_v21 = vld [vmem:[#allocation4 + $0x10] ss:$2 sm:$0xff]  ;;  %v2063_v18 = vmax.f32 %v2018_v55, %v2042_v16  ;;  %v2038_v36 = vld [vmem:[#allocation4 + $0x1] ss:$2 sm:$0xff] }
 0x26d   : > { %v1898_v29 = vpop.f32.mrf.mxu1  ;;  %v2028_v49 = vld [vmem:[#allocation4 + $0x70] ss:$2 sm:$0xff]  ;;  %v2052_v42 = vld [vmem:[#allocation4 + $0x71] ss:$2 sm:$0xff]  ;;  %v2062_v4 = vmax.f32 %v2016_v21, %v2040_v3  ;;  %v2061_v56 = vmax.f32 %v2014_v27, %v2038_v36  ;;  %v2857_v52 = vld [vmem:[%s3451_s4 + $0x10] ss:$0 sps:$4 sm:$0xff]  }
 0x26e   : > { %2009 = vst.msk [vmem:[#allocation4 + $0x98] sm:$0xff] %vm1989_vm4, %v1984_v53  ;;  %v1982_v22 = vmax.f32 %v1958_v28, 0.0  ;;  %v1963_v44 = vadd.f32 %v3298_v47, %v1935_v45  ;;  %v1933_v38 = vadd.f32 %v1898_v29, %v1691_v20  ;;  %v2068_v11 = vmax.f32 %v2028_v49, %v2052_v42  ;;  %v2858_v53 = vld [vmem:[%s3451_s4 + $0x8] sm:$0xff]   ;;  %v2859_v28 = vld [vmem:[%s3451_s4] sm:$0xff]  }
 0x26f   : > { %v2762_v2 = vpop.f32.mrf.mxu1  ;;  %v2026_v54 = vld [vmem:[#allocation4 + $0x60] ss:$2 sm:$0xff]  ;;  %v2050_v19 = vld [vmem:[#allocation4 + $0x61] ss:$2 sm:$0xff]  ;;  %v2250_v20 = vsel %vm2176_vm3, %v2857_v52, 0 }
 0x270   : > { %2007 = vst.msk [vmem:[#allocation4 + $0x88] sm:$0xff] %vm1989_vm4, %v1982_v22  ;;  %v1987_v5 = vmax.f32 %v1963_v44, 0.0  ;;  %v1961_v46 = vadd.f32 %v3298_v47, %v1933_v38  ;;  %v1936_v32 = vadd.f32 %v2762_v2, %v1694_v7  ;;  %v2067_v51 = vmax.f32 %v2026_v54, %v2050_v19  ;;  %v2487_v45 = vld [vmem:[%s3452_s5 + $0x2] ss:$0 sm:$0xff] }
 0x271   : > { %v1901_v9 = vpop.f32.mrf.mxu1 }
 0x272   : > { %2012 = vst.msk [vmem:[#allocation4 + $0xb0] sm:$0xff] %vm1989_vm4, %v1987_v5  ;;  %v1985_v60 = vmax.f32 %v1961_v46, 0.0  ;;  %v1964_v17 = vadd.f32 %v3298_v47, %v1936_v32  ;;  %v1934_v40 = vadd.f32 %v1901_v9, %v1692_v39  ;;  %v2492_v5 = vld [vmem:[%s3452_s5 + $0x3] ss:$0 sm:$0xff] }
 0x274   : > { %2010 = vst.msk [vmem:[#allocation4 + $0xa0] sm:$0xff] %vm1989_vm4, %v1985_v60  ;;  %v1988_v10 = vmax.f32 %v1964_v17, 0.0  ;;  %v1962_v23 = vadd.f32 %v3298_v47, %v1934_v40 }
 0x275   : > { %v2032_v31 = vld [vmem:[#allocation4 + $0x90] ss:$2 sm:$0xff]  ;;  %v2056_v25 = vld [vmem:[#allocation4 + $0x91] ss:$2 sm:$0xff] }
 0x276   : > { %2013 = vst.msk [vmem:[#allocation4 + $0xb8] sm:$0xff] %vm1989_vm4, %v1988_v10  ;;  %v1986_v48 = vmax.f32 %v1962_v23, 0.0  ;;  %v2070_v47 = vmax.f32 %v2032_v31, %v2056_v25 }
 0x277   : > { %v2030_v34 = vld [vmem:[#allocation4 + $0x80] ss:$2 sm:$0xff]  ;;  %v2054_v63 = vld [vmem:[#allocation4 + $0x81] ss:$2 sm:$0xff] }
 0x278   : > { %2011 = vst.msk [vmem:[#allocation4 + $0xa8] sm:$0xff] %vm1989_vm4, %v1986_v48  ;;  %v2069_v14 = vmax.f32 %v2030_v34, %v2054_v63 }
 0x27d   : > { %v2036_v33 = vld [vmem:[#allocation4 + $0xb0] ss:$2 sm:$0xff]  ;;  %v2060_v57 = vld [vmem:[#allocation4 + $0xb1] ss:$2 sm:$0xff] }
 0x27e   : > { %v2072_v24 = vmax.f32 %v2036_v33, %v2060_v57 }
 0x27f   : > { %v2034_v41 = vld [vmem:[#allocation4 + $0xa0] ss:$2 sm:$0xff]  ;;  %v2058_v12 = vld [vmem:[#allocation4 + $0xa1] ss:$2 sm:$0xff] }
 0x280   : > { %2764 = vmatpush3.msra.mxu0 %v2072_v24  ;;  %v2071_v8 = vmax.f32 %v2034_v41, %v2058_v12 }
 0x281   : > { %2765 = vmatprep.subr.mxu0 %v3473_v62 }
 0x282   : > { %2766 = vmatpush3.msra.mxu0 %v2071_v8 }
 0x283   : > { %2767 = vmatprep.subr.mxu0 %v3473_v62 }
 0x284   : > { %2768 = vmatpush3.msra.mxu0 %v2070_v47 }
 0x285   : > { %2769 = vmatprep.subr.mxu0 %v3473_v62 }
 0x286   : > { %2770 = vmatpush3.msra.mxu0 %v2069_v14 }
 0x287   : > { %2771 = vmatprep.subr.mxu0 %v3473_v62 }
 0x288   : > { %2772 = vmatpush3.msra.mxu0 %v2068_v11 }
 0x289   : > { %2773 = vmatprep.subr.mxu0 %v3473_v62 }
 0x28a   : > { %2774 = vmatpush3.msra.mxu0 %v2067_v51 }
 0x28b   : > { %2775 = vmatprep.subr.mxu0 %v3473_v62 }
 0x28c   : > { %2776 = vmatpush3.msra.mxu0 %v2066_v15 }
 0x28d   : > { %2777 = vmatprep.subr.mxu0 %v3473_v62 }
 0x28e   : > { %2778 = vmatpush3.msra.mxu0 %v2065_v26 }
 0x28f   : > { %2779 = vmatprep.subr.mxu0 %v3473_v62 }
 0x290   : > { %2780 = vmatpush3.msra.mxu0 %v2064_v61 }
 0x291   : > { %2781 = vmatprep.subr.mxu0 %v3473_v62 }
 0x292   : > { %2782 = vmatpush3.msra.mxu0 %v2063_v18 }
 0x293   : > { %2783 = vmatprep.subr.mxu0 %v3473_v62 }
 0x294   : > { %2784 = vmatpush3.msra.mxu0 %v2062_v4 }
 0x295   : > { %2785 = vmatprep.subr.mxu0 %v3473_v62 }
 0x296   : > { %2786 = vmatpush3.msra.mxu0 %v2061_v56 }
 0x297   : > { %2788 = vmatmul.mubr.msk.f32.vlgmr.msra.gmra.mxu0 %vm2074_vm5, %v2073_v50  ;;  %2800 = vmatprep.subr.bf16.mxu0 %v3473_v62 }
 0x298   : > { %2806 = vmatprep.mubr.msk.bf16.mxu0 %vm2869_vm2, %v3473_v62  ;;  %2801 = vmatpush3.bf16.msra.mxu0 %v2250_v20 }
 0x299   : > { %2802 = vmatprep.subr.bf16.mxu0 %v3473_v62 }
 0x29c   : > { %2803 = vmatpush3.bf16.msra.mxu0 %v2858_v53 }
 0x29d   : > { %2804 = vmatprep.subr.bf16.mxu0 %v3473_v62 }
 0x2a0   : > { %2805 = vmatpush3.bf16.msra.mxu0 %v2859_v28 }
 0x357   : > { %v2144_v37 = vpop.f32.mrf.mxu0 }
 0x358   : > { %v2148_v6 = vpack.c.bf16 %v2144_v37, %v2144_v37 }
 0x359   : > { %v2789_v0 = vpop.f32.mrf.mxu0 }
 0x35a   : > { %2797 = vmatmul.mubr.msk.bf16.vlgmr.msra.gmra.mxu1 %vm1989_vm4, %v2148_v6 }
 0x41a   : > { %v2214_v29 = vpop.f32.mrf.mxu1 }
 0x41b   : > { %v2215_v22 = vadd.f32 %v2487_v45, %v2214_v29 }
 0x41c   : > { %v2798_v44 = vpop.f32.mrf.mxu1 }
 0x41d   : > { %v2220_v38 = vmax.f32 %v2215_v22, 0.0 }
 0x41e   : > { %v2217_v7 = vpop.f32.mrf.mxu1 }
 0x41f   : > { %v2221_v59 = vpack.c.bf16 %v2220_v38, %v2220_v38 }
 0x420   : > { %v2799_v2 = vpop.f32.mrf.mxu1 }
 0x421   : > { %2807 = vmatmul.mubr.msk.bf16.vlgmr.msra.gmra.mxu0 %vm1989_vm4, %v2221_v59 }
 0x4e1   : > { %v2286_v46 = vpop.f32.mrf.mxu0 }
 0x4e2   : > { %v2287_v32 = vadd.f32 %v2492_v5, %v2286_v46 }
 0x4e3   : > { %v2808_v39 = vpop.f32.mrf.mxu0 }
 0x4e4   : > { %2293 = vst.msk [vmem:[%s293_s9] sm:$0x3f] %vm2292_vm6, %v2287_v32 }
 0x4e5   : > { %v2289_v9 = vpop.f32.mrf.mxu0 }
 0x4e7   : > { %v2809_v60 = vpop.f32.mrf.mxu0 }
 0x4e8 PF: > { %s17_s24 = sadd.s32 1, %s2866_s24  }
 0x4e9   : > { %p14_p4 = scmp.ge.s32.totalorder %s17_s24, 6  }
 0x4eb   :  { %16 = sbr.rel (!%p14_p4) target bundleno = 1 (0x1), region = 154 }

</bundles_post_ra>
